<compile_context>
chip_gen: v6e
topology: v6e:2x2x1
jax: 0.10.0
libtpu: 0.0.40
codegen_flags: <defaults>
</compile_context>

<pallas_src>
import functools

import jax
import jax.numpy as jnp
from jax import lax
from jax.experimental import pallas as pl
from jax.experimental.pallas import tpu as pltpu

C_IN = 128    # block input/output channels
C_MID = 64    # bottleneck channels
KSIZE = 7     # dilated conv kernel size


# ---------------------------------------------------------------------------
# Kernel
# ---------------------------------------------------------------------------
def mgtcm_kernel(dila,
                 x_ref,        # (1, 128, T_tile)     input time tile
                 halo_ref,     # (1, 1, 128, 2*pad)   left/right halo of the tile
                 w_in_ref,     # (64, 128)  bf16      1x1 in_conv weight
                 wst_l_ref,    # (64, 448)  bf16      stacked dilated conv (BN scale folded)
                 wst_r_ref,    # (64, 448)  bf16
                 w_o_ref,      # (128, 64)  bf16      1x1 out_conv weight (BN scale folded)
                 vec_ref,      # (64, 8)    f32       packed per-channel vectors
                 b_o_ref,      # (128, 1)   f32       out_conv bias (BN shift folded)
                 out_ref):     # (1, 128, T_tile)
    pad = 3 * dila
    t_tile = out_ref.shape[2]
    wd = t_tile + 2 * pad                         # width of the halo'ed window

    # packed per-channel vectors: [b_in, t_l, b_l, t_r, b_r, a_l, a_r, a_o]
    vec = vec_ref[...]
    b_in = vec[:, 0:1]
    t_l, b_l = vec[:, 1:2], vec[:, 2:3]
    t_r, b_r = vec[:, 3:4], vec[:, 4:5]
    a_l, a_r, a_o = vec[:, 5:6], vec[:, 6:7], vec[:, 7:8]

    # halo'ed input window (128, wd), bf16 operands for the MXU
    xc = x_ref[0]                                 # (128, T_tile), input dtype
    halo = halo_ref[0, 0]                         # (128, 2*pad)
    xh = jnp.concatenate(
        [halo[:, :pad].astype(jnp.bfloat16),
         xc.astype(jnp.bfloat16),
         halo[:, pad:].astype(jnp.bfloat16)], axis=-1)            # (128, wd)

    # Columns of the window outside the true sequence must behave as the
    # dilated conv's zero padding.  Because pad <= T_tile this is
    # all-or-nothing per halo side (only the first / last time tile clips).
    t_idx = pl.program_id(1)
    col = lax.broadcasted_iota(jnp.int32, (1, wd), 1)
    valid = jnp.logical_and(
        jnp.logical_or(col >= pad, t_idx > 0),
        jnp.logical_or(col < pad + t_tile, t_idx < pl.num_programs(1) - 1))

    # in_conv: 1x1 conv == (64,128)@(128,wd) MXU matmul, f32 accumulation
    y = jnp.dot(w_in_ref[...], xh,
                preferred_element_type=jnp.float32) + b_in        # (64, wd)

    def branch(alpha, tshift, wst_ref, bias):
        # PReLU + fused-BN shift (scale is folded into wst columns), then
        # zero out the invalid halo columns (== the conv's zero padding).
        u = jnp.where(y > 0.0, y, alpha * y) + tshift
        u = jnp.where(valid, u, 0.0).astype(jnp.bfloat16)         # (64, wd)
        # stack the 7 dilated taps along the contraction axis -> (448, T_tile)
        slab = jnp.concatenate(
            [u[:, k * dila: k * dila + t_tile] for k in range(KSIZE)],
            axis=0)
        return jnp.dot(wst_ref[...], slab,
                       preferred_element_type=jnp.float32) + bias  # (64, T_tile)

    x1 = branch(a_l, t_l, wst_l_ref, b_l)
    x2 = jax.nn.sigmoid(branch(a_r, t_r, wst_r_ref, b_r))
    m = x1 * x2

    # out_conv: PReLU, BN folded into w_o/b_o, 1x1 conv, residual add
    zo = jnp.where(m > 0.0, m, a_o * m).astype(jnp.bfloat16)
    out = (jnp.dot(w_o_ref[...], zo, preferred_element_type=jnp.float32)
           + b_o_ref[...] + xc.astype(jnp.float32))
    out_ref[0] = out.astype(out_ref.dtype)


# ---------------------------------------------------------------------------
# JAX glue: BN folding, weight stacking, halo construction, pallas_call
# ---------------------------------------------------------------------------
def _choose_t_tile(T, pad, cap):
    if T <= cap:
        return T
    for cand in (2048, 1024, 512, 256, 128):
        if cand <= cap and T % cand == 0 and cand >= pad:
            return cand
    return T        # fallback: whole time axis in one tile


def prepare_params(params, dila):
    """Fold eval-mode BN into the conv weights and pack the small vectors.

    `params` layout (matches the PyTorch module, BN fused to scale/shift):
      w_in (64,128), b_in (64,1)
      per branch n in {l,r}: a_n (1,1) PReLU, s_n/t_n (64,1) BN scale/shift,
                             w_n (7,64,64) dilated conv (K,O,I), b_n (64,1)
      out: a_o (1,1), s_o/t_o (64,1), w_o (128,64), b_o (128,1)
    """
    del dila
    f32 = jnp.float32

    def stacked(name):
        w = params[f"w_{name}"].astype(f32)                       # (K, O, I)
        s = params[f"s_{name}"].astype(f32).reshape(1, 1, C_MID)
        w = w * s                                                 # fold BN scale
        return jnp.transpose(w, (1, 0, 2)).reshape(C_MID, KSIZE * C_MID)

    s_o = params["s_o"].astype(f32)
    t_o = params["t_o"].astype(f32)
    w_o_folded = params["w_o"].astype(f32) * s_o.reshape(1, C_MID)
    b_o_folded = params["w_o"].astype(f32) @ t_o + params["b_o"].astype(f32)

    def col(v):
        return v.astype(f32).reshape(C_MID, 1)

    def alpha_col(name):
        a = params[f"a_{name}"].astype(f32).reshape(())
        return jnp.full((C_MID, 1), a, f32)

    # BN shift is applied before the zero padding; since the scale is folded
    # into the conv weights the shift becomes t/s (BN scale is never 0).
    vec = jnp.concatenate(
        [col(params["b_in"]),
         col(params["t_l"]) / col(params["s_l"]), col(params["b_l"]),
         col(params["t_r"]) / col(params["s_r"]), col(params["b_r"]),
         alpha_col("l"), alpha_col("r"), alpha_col("o")], axis=1)   # (64, 8)

    return dict(w_in=params["w_in"].astype(jnp.bfloat16),
                wst_l=stacked("l").astype(jnp.bfloat16),
                wst_r=stacked("r").astype(jnp.bfloat16),
                w_o=w_o_folded.astype(jnp.bfloat16),
                vec=vec,
                b_o=b_o_folded)


def mgtcm_block(x, params, dila, t_tile_max=2048):
    """MGTCMBlock forward.  x: (N, 128, T) -> (N, 128, T)."""
    N, C, T = x.shape
    assert C == C_IN
    dila = int(dila)
    pad = 3 * dila
    t_tile = _choose_t_tile(T, pad, t_tile_max)
    assert T % t_tile == 0 and pad <= t_tile
    nt = T // t_tile

    kp = prepare_params(params, dila)

    # Per-tile halos: for time tile t, the `pad` samples just left / right of
    # the tile (zeros outside the sequence; those columns are masked in-kernel).
    xp = jnp.pad(x, ((0, 0), (0, 0), (pad, pad)))
    base = jnp.arange(nt) * t_tile
    idx = jnp.concatenate(
        [base[:, None] + jnp.arange(pad)[None, :],
         base[:, None] + (t_tile + pad) + jnp.arange(pad)[None, :]], axis=1)
    halos = jnp.transpose(xp[:, :, idx], (0, 2, 1, 3))     # (N, nt, 128, 2*pad)

    def rep(a):          # full-array operand, stays resident across the grid
        return pl.BlockSpec(a.shape, lambda n, t, _nd=a.ndim: (0,) * _nd)

    in_specs = [
        pl.BlockSpec((1, C_IN, t_tile), lambda n, t: (n, 0, t)),
        pl.BlockSpec((1, 1, C_IN, 2 * pad), lambda n, t: (n, t, 0, 0)),
        rep(kp["w_in"]), rep(kp["wst_l"]), rep(kp["wst_r"]), rep(kp["w_o"]),
        rep(kp["vec"]), rep(kp["b_o"]),
    ]
    out_specs = pl.BlockSpec((1, C_IN, t_tile), lambda n, t: (n, 0, t))

    return pl.pallas_call(
        functools.partial(mgtcm_kernel, dila),
        out_shape=jax.ShapeDtypeStruct((N, C_IN, T), x.dtype),
        grid_spec=pltpu.PrefetchScalarGridSpec(
            num_scalar_prefetch=0,
            grid=(N, nt),
            in_specs=in_specs,
            out_specs=out_specs),
        compiler_params=pltpu.CompilerParams(
            dimension_semantics=("parallel", "parallel")),
    )(x, halos, kp["w_in"], kp["wst_l"], kp["wst_r"], kp["w_o"],
      kp["vec"], kp["b_o"])


# ---------------------------------------------------------------------------
# Parameter init (PyTorch-like layout, BN fused to eval-mode scale/shift)
# ---------------------------------------------------------------------------
def init_params(key, dila_rate):
    del dila_rate  # parameter shapes do not depend on the dilation rate
    keys = iter(jax.random.split(key, 40))

    def u(shape, scale):
        return (jax.random.uniform(next(keys), shape, jnp.float32) * 2.0 - 1.0) * scale

    eps = 1e-5

    def fused_bn(c):
        gamma = 1.0 + u((c,), 0.1)
        beta = u((c,), 0.1)
        mean = u((c,), 0.2)
        var = 1.0 + u((c,), 0.3) ** 2
        scale = gamma * jax.lax.rsqrt(var + eps)
        shift = beta - mean * scale
        return scale.reshape(c, 1), shift.reshape(c, 1)

    p = {}
    p["w_in"] = u((C_MID, C_IN), 0.1)          # Conv1d(128,64,1) weight (O, I)
    p["b_in"] = u((C_MID, 1), 0.1)
    for name in ("l", "r"):
        p[f"a_{name}"] = jnp.full((1, 1), 0.25, jnp.float32)     # PReLU init
        p[f"s_{name}"], p[f"t_{name}"] = fused_bn(C_MID)
        p[f"w_{name}"] = u((KSIZE, C_MID, C_MID), 0.05)          # (K, O, I)
        p[f"b_{name}"] = u((C_MID, 1), 0.1)
    p["a_o"] = jnp.full((1, 1), 0.25, jnp.float32)
    p["s_o"], p["t_o"] = fused_bn(C_MID)
    p["w_o"] = u((C_IN, C_MID), 0.1)           # Conv1d(64,128,1) weight (O, I)
    p["b_o"] = u((C_IN, 1), 0.1)
    return p


# ---------------------------------------------------------------------------
# Pure-JAX f32 reference with identical (eval-mode BN) semantics
# ---------------------------------------------------------------------------
def reference(x, p, dila):
    def prelu(z, a):
        return jnp.where(z > 0, z, a * z)

    y = jnp.einsum("oc,nct->not", p["w_in"], x) + p["b_in"][None]

    def branch(name):
        z = prelu(y, p[f"a_{name}"][0, 0])
        z = z * p[f"s_{name}"][None] + p[f"t_{name}"][None]
        pad = 3 * dila
        zp = jnp.pad(z, ((0, 0), (0, 0), (pad, pad)))
        T = z.shape[2]
        out = jnp.zeros_like(z) + p[f"b_{name}"][None]
        for k in range(KSIZE):
            out = out + jnp.einsum("oc,nct->not", p[f"w_{name}"][k],
                                   zp[:, :, k * dila: k * dila + T])
        return out

    x1 = branch("l")
    x2 = jax.nn.sigmoid(branch("r"))
    m = x1 * x2
    z = prelu(m, p["a_o"][0, 0])
    z = z * p["s_o"][None] + p["t_o"][None]
    return jnp.einsum("oc,nct->not", p["w_o"], z) + p["b_o"][None] + x


if __name__ == "__main__":
    key = jax.random.PRNGKey(0)
    kx, kx2, kp = jax.random.split(key, 3)

    params = init_params(kp, 2)

    # benchmark-like config: N=2, T=128, dilation 2 (single time tile)
    N, T, dila_rate = 2, 128, 2
    x = jax.random.normal(kx, (N, C_IN, T), jnp.float32)
    out = jax.block_until_ready(mgtcm_block(x, params, dila_rate))
    ref = reference(x, params, dila_rate)
    assert out.shape == (N, C_IN, T)
    err = float(jnp.max(jnp.abs(out - ref)))
    # bf16 MXU operands (f32 accumulation): a few 1e-3 of absolute error is
    # expected at these O(1) magnitudes, hence the loosened tolerance.
    assert err < 5e-2, f"max abs err {err}"

    # exercise the time-tiled path (halo handling): T=384 split into 3 tiles
    x2 = jax.random.normal(kx2, (1, C_IN, 384), jnp.float32)
    out2 = jax.block_until_ready(mgtcm_block(x2, params, 3, t_tile_max=128))
    ref2 = reference(x2, params, 3)
    err2 = float(jnp.max(jnp.abs(out2 - ref2)))
    assert err2 < 5e-2, f"max abs err (tiled) {err2}"

    print("KERNEL_OK")
</pallas_src>

<mosaic_0001>
module attributes {stable_mosaic.version = 11 : i64} {
  func.func @mgtcm_kernel(%arg0: i32, %arg1: i32, %arg2: memref<1x128x128xf32, #tpu.memory_space<vmem>>, %arg3: memref<1x1x128x12xf32, #tpu.memory_space<vmem>>, %arg4: memref<64x128xbf16, #tpu.memory_space<vmem>>, %arg5: memref<64x448xbf16, #tpu.memory_space<vmem>>, %arg6: memref<64x448xbf16, #tpu.memory_space<vmem>>, %arg7: memref<128x64xbf16, #tpu.memory_space<vmem>>, %arg8: memref<64x8xf32, #tpu.memory_space<vmem>>, %arg9: memref<128x1xf32, #tpu.memory_space<vmem>>, %arg10: memref<1x128x128xf32, #tpu.memory_space<vmem>>) attributes {dimension_semantics = [#tpu.dimension_semantics<parallel>, #tpu.dimension_semantics<parallel>], iteration_bounds = array<i64: 2, 1>, scalar_prefetch = 0 : i64, scratch_operands = 0 : i64, tpu.core_type = #tpu.core_type<tc>, window_params = [{transform_indices = @transform_0, window_bounds = array<i64: 1, 128, 128>}, {transform_indices = @transform_1, window_bounds = array<i64: 1, 1, 128, 12>}, {pipeline_mode = #tpu.pipeline_mode<synchronous>, transform_indices = @transform_2, window_bounds = array<i64: 64, 128>}, {pipeline_mode = #tpu.pipeline_mode<synchronous>, transform_indices = @transform_3, window_bounds = array<i64: 64, 448>}, {pipeline_mode = #tpu.pipeline_mode<synchronous>, transform_indices = @transform_4, window_bounds = array<i64: 64, 448>}, {pipeline_mode = #tpu.pipeline_mode<synchronous>, transform_indices = @transform_5, window_bounds = array<i64: 128, 64>}, {pipeline_mode = #tpu.pipeline_mode<synchronous>, transform_indices = @transform_6, window_bounds = array<i64: 64, 8>}, {pipeline_mode = #tpu.pipeline_mode<synchronous>, transform_indices = @transform_7, window_bounds = array<i64: 128, 1>}, {transform_indices = @transform_8, window_bounds = array<i64: 1, 128, 128>}]} {
    %c0 = arith.constant 0 : index
    %c0_0 = arith.constant 0 : index
    %0 = vector.load %arg8[%c0, %c0_0] : memref<64x8xf32, #tpu.memory_space<vmem>>, vector<64x8xf32>
    %1 = vector.extract_strided_slice %0 {offsets = [0, 0], sizes = [64, 1], strides = [1, 1]} : vector<64x8xf32> to vector<64x1xf32>
    %2 = vector.extract_strided_slice %0 {offsets = [0, 1], sizes = [64, 1], strides = [1, 1]} : vector<64x8xf32> to vector<64x1xf32>
    %3 = vector.extract_strided_slice %0 {offsets = [0, 2], sizes = [64, 1], strides = [1, 1]} : vector<64x8xf32> to vector<64x1xf32>
    %4 = vector.extract_strided_slice %0 {offsets = [0, 3], sizes = [64, 1], strides = [1, 1]} : vector<64x8xf32> to vector<64x1xf32>
    %5 = vector.extract_strided_slice %0 {offsets = [0, 4], sizes = [64, 1], strides = [1, 1]} : vector<64x8xf32> to vector<64x1xf32>
    %6 = vector.extract_strided_slice %0 {offsets = [0, 5], sizes = [64, 1], strides = [1, 1]} : vector<64x8xf32> to vector<64x1xf32>
    %7 = vector.extract_strided_slice %0 {offsets = [0, 6], sizes = [64, 1], strides = [1, 1]} : vector<64x8xf32> to vector<64x1xf32>
    %8 = vector.extract_strided_slice %0 {offsets = [0, 7], sizes = [64, 1], strides = [1, 1]} : vector<64x8xf32> to vector<64x1xf32>
    %c0_1 = arith.constant 0 : index
    %c0_2 = arith.constant 0 : index
    %c0_3 = arith.constant 0 : index
    %9 = vector.load %arg2[%c0_1, %c0_2, %c0_3] : memref<1x128x128xf32, #tpu.memory_space<vmem>>, vector<1x128x128xf32>
    %10 = vector.shape_cast %9 : vector<1x128x128xf32> to vector<128x128xf32>
    %c0_4 = arith.constant 0 : index
    %c0_5 = arith.constant 0 : index
    %c0_6 = arith.constant 0 : index
    %c0_7 = arith.constant 0 : index
    %11 = vector.load %arg3[%c0_4, %c0_5, %c0_6, %c0_7] : memref<1x1x128x12xf32, #tpu.memory_space<vmem>>, vector<1x1x128x12xf32>
    %12 = vector.shape_cast %11 : vector<1x1x128x12xf32> to vector<128x12xf32>
    %13 = vector.extract_strided_slice %12 {offsets = [0, 0], sizes = [128, 6], strides = [1, 1]} : vector<128x12xf32> to vector<128x6xf32>
    %14 = arith.truncf %13 : vector<128x6xf32> to vector<128x6xbf16>
    %15 = arith.truncf %10 : vector<128x128xf32> to vector<128x128xbf16>
    %16 = vector.extract_strided_slice %12 {offsets = [0, 6], sizes = [128, 6], strides = [1, 1]} : vector<128x12xf32> to vector<128x6xf32>
    %17 = arith.truncf %16 : vector<128x6xf32> to vector<128x6xbf16>
    %18 = tpu.concatenate %14, %15, %17 in 1 : vector<128x6xbf16>, vector<128x128xbf16>, vector<128x6xbf16> -> vector<128x140xbf16>
    %19 = tpu.iota {dimensions = array<i32: 1>} : vector<1x140xi32>
    %c6_i32 = arith.constant 6 : i32
    %20 = vector.broadcast %c6_i32 : i32 to vector<1x140xi32>
    %21 = arith.cmpi sge, %19, %20 : vector<1x140xi32>
    %c0_i32 = arith.constant 0 : i32
    %22 = arith.cmpi sgt, %arg1, %c0_i32 : i32
    %23 = vector.broadcast %22 : i1 to vector<1x140xi1>
    %24 = arith.ori %21, %23 : vector<1x140xi1>
    %c134_i32 = arith.constant 134 : i32
    %25 = vector.broadcast %c134_i32 : i32 to vector<1x140xi32>
    %26 = arith.cmpi slt, %19, %25 : vector<1x140xi32>
    %c0_i32_8 = arith.constant 0 : i32
    %27 = arith.cmpi slt, %arg1, %c0_i32_8 : i32
    %28 = vector.broadcast %27 : i1 to vector<1x140xi1>
    %29 = arith.ori %26, %28 : vector<1x140xi1>
    %30 = arith.andi %24, %29 : vector<1x140xi1>
    %c0_9 = arith.constant 0 : index
    %c0_10 = arith.constant 0 : index
    %31 = vector.load %arg4[%c0_9, %c0_10] : memref<64x128xbf16, #tpu.memory_space<vmem>>, vector<64x128xbf16>
    %cst = arith.constant dense<0.000000e+00> : vector<64x140xf32>
    %32 = tpu.matmul %31, %18, %cst {dimension_numbers = #tpu.dot_dimension_numbers<[1], [0], [0], [1], [0, 0, 1, 1], [], []>} : vector<64x128xbf16>, vector<128x140xbf16>, vector<64x140xf32> -> vector<64x140xf32>
    %33 = vector.broadcast %1 : vector<64x1xf32> to vector<64x140xf32>
    %34 = arith.addf %32, %33 : vector<64x140xf32>
    %cst_11 = arith.constant 0.000000e+00 : f32
    %35 = vector.broadcast %cst_11 : f32 to vector<64x140xf32>
    %36 = arith.cmpf ogt, %34, %35 : vector<64x140xf32>
    %37 = vector.broadcast %6 : vector<64x1xf32> to vector<64x140xf32>
    %38 = arith.mulf %37, %34 : vector<64x140xf32>
    %39 = arith.select %36, %34, %38 : vector<64x140xi1>, vector<64x140xf32>
    %40 = vector.broadcast %2 : vector<64x1xf32> to vector<64x140xf32>
    %41 = arith.addf %39, %40 : vector<64x140xf32>
    %cst_12 = arith.constant 0.000000e+00 : f32
    %42 = vector.shape_cast %30 : vector<1x140xi1> to vector<1x140xi1>
    %43 = vector.broadcast %42 : vector<1x140xi1> to vector<64x140xi1>
    %44 = vector.broadcast %cst_12 : f32 to vector<64x140xf32>
    %45 = arith.select %43, %41, %44 : vector<64x140xi1>, vector<64x140xf32>
    %46 = arith.truncf %45 : vector<64x140xf32> to vector<64x140xbf16>
    %47 = vector.extract_strided_slice %46 {offsets = [0, 0], sizes = [64, 128], strides = [1, 1]} : vector<64x140xbf16> to vector<64x128xbf16>
    %48 = vector.extract_strided_slice %46 {offsets = [0, 2], sizes = [64, 128], strides = [1, 1]} : vector<64x140xbf16> to vector<64x128xbf16>
    %49 = vector.extract_strided_slice %46 {offsets = [0, 4], sizes = [64, 128], strides = [1, 1]} : vector<64x140xbf16> to vector<64x128xbf16>
    %50 = vector.extract_strided_slice %46 {offsets = [0, 6], sizes = [64, 128], strides = [1, 1]} : vector<64x140xbf16> to vector<64x128xbf16>
    %51 = vector.extract_strided_slice %46 {offsets = [0, 8], sizes = [64, 128], strides = [1, 1]} : vector<64x140xbf16> to vector<64x128xbf16>
    %52 = vector.extract_strided_slice %46 {offsets = [0, 10], sizes = [64, 128], strides = [1, 1]} : vector<64x140xbf16> to vector<64x128xbf16>
    %53 = vector.extract_strided_slice %46 {offsets = [0, 12], sizes = [64, 128], strides = [1, 1]} : vector<64x140xbf16> to vector<64x128xbf16>
    %54 = tpu.concatenate %47, %48, %49, %50, %51, %52, %53 in 0 : vector<64x128xbf16>, vector<64x128xbf16>, vector<64x128xbf16>, vector<64x128xbf16>, vector<64x128xbf16>, vector<64x128xbf16>, vector<64x128xbf16> -> vector<448x128xbf16>
    %c0_13 = arith.constant 0 : index
    %c0_14 = arith.constant 0 : index
    %55 = vector.load %arg5[%c0_13, %c0_14] : memref<64x448xbf16, #tpu.memory_space<vmem>>, vector<64x448xbf16>
    %cst_15 = arith.constant dense<0.000000e+00> : vector<64x128xf32>
    %56 = tpu.matmul %55, %54, %cst_15 {dimension_numbers = #tpu.dot_dimension_numbers<[1], [0], [0], [1], [0, 0, 1, 1], [], []>} : vector<64x448xbf16>, vector<448x128xbf16>, vector<64x128xf32> -> vector<64x128xf32>
    %57 = vector.broadcast %3 : vector<64x1xf32> to vector<64x128xf32>
    %58 = arith.addf %56, %57 : vector<64x128xf32>
    %cst_16 = arith.constant 0.000000e+00 : f32
    %59 = vector.broadcast %cst_16 : f32 to vector<64x140xf32>
    %60 = arith.cmpf ogt, %34, %59 : vector<64x140xf32>
    %61 = vector.broadcast %7 : vector<64x1xf32> to vector<64x140xf32>
    %62 = arith.mulf %61, %34 : vector<64x140xf32>
    %63 = arith.select %60, %34, %62 : vector<64x140xi1>, vector<64x140xf32>
    %64 = vector.broadcast %4 : vector<64x1xf32> to vector<64x140xf32>
    %65 = arith.addf %63, %64 : vector<64x140xf32>
    %cst_17 = arith.constant 0.000000e+00 : f32
    %66 = vector.shape_cast %30 : vector<1x140xi1> to vector<1x140xi1>
    %67 = vector.broadcast %66 : vector<1x140xi1> to vector<64x140xi1>
    %68 = vector.broadcast %cst_17 : f32 to vector<64x140xf32>
    %69 = arith.select %67, %65, %68 : vector<64x140xi1>, vector<64x140xf32>
    %70 = arith.truncf %69 : vector<64x140xf32> to vector<64x140xbf16>
    %71 = vector.extract_strided_slice %70 {offsets = [0, 0], sizes = [64, 128], strides = [1, 1]} : vector<64x140xbf16> to vector<64x128xbf16>
    %72 = vector.extract_strided_slice %70 {offsets = [0, 2], sizes = [64, 128], strides = [1, 1]} : vector<64x140xbf16> to vector<64x128xbf16>
    %73 = vector.extract_strided_slice %70 {offsets = [0, 4], sizes = [64, 128], strides = [1, 1]} : vector<64x140xbf16> to vector<64x128xbf16>
    %74 = vector.extract_strided_slice %70 {offsets = [0, 6], sizes = [64, 128], strides = [1, 1]} : vector<64x140xbf16> to vector<64x128xbf16>
    %75 = vector.extract_strided_slice %70 {offsets = [0, 8], sizes = [64, 128], strides = [1, 1]} : vector<64x140xbf16> to vector<64x128xbf16>
    %76 = vector.extract_strided_slice %70 {offsets = [0, 10], sizes = [64, 128], strides = [1, 1]} : vector<64x140xbf16> to vector<64x128xbf16>
    %77 = vector.extract_strided_slice %70 {offsets = [0, 12], sizes = [64, 128], strides = [1, 1]} : vector<64x140xbf16> to vector<64x128xbf16>
    %78 = tpu.concatenate %71, %72, %73, %74, %75, %76, %77 in 0 : vector<64x128xbf16>, vector<64x128xbf16>, vector<64x128xbf16>, vector<64x128xbf16>, vector<64x128xbf16>, vector<64x128xbf16>, vector<64x128xbf16> -> vector<448x128xbf16>
    %c0_18 = arith.constant 0 : index
    %c0_19 = arith.constant 0 : index
    %79 = vector.load %arg6[%c0_18, %c0_19] : memref<64x448xbf16, #tpu.memory_space<vmem>>, vector<64x448xbf16>
    %cst_20 = arith.constant dense<0.000000e+00> : vector<64x128xf32>
    %80 = tpu.matmul %79, %78, %cst_20 {dimension_numbers = #tpu.dot_dimension_numbers<[1], [0], [0], [1], [0, 0, 1, 1], [], []>} : vector<64x448xbf16>, vector<448x128xbf16>, vector<64x128xf32> -> vector<64x128xf32>
    %81 = vector.broadcast %5 : vector<64x1xf32> to vector<64x128xf32>
    %82 = arith.addf %80, %81 : vector<64x128xf32>
    %83 = arith.negf %82 : vector<64x128xf32>
    %84 = math.exp %83 : vector<64x128xf32>
    %cst_21 = arith.constant 1.000000e+00 : f32
    %85 = vector.broadcast %cst_21 : f32 to vector<64x128xf32>
    %86 = arith.addf %85, %84 : vector<64x128xf32>
    %87 = arith.divf %85, %86 : vector<64x128xf32>
    %88 = arith.mulf %58, %87 : vector<64x128xf32>
    %cst_22 = arith.constant 0.000000e+00 : f32
    %89 = vector.broadcast %cst_22 : f32 to vector<64x128xf32>
    %90 = arith.cmpf ogt, %88, %89 : vector<64x128xf32>
    %91 = vector.broadcast %8 : vector<64x1xf32> to vector<64x128xf32>
    %92 = arith.mulf %91, %88 : vector<64x128xf32>
    %93 = arith.select %90, %88, %92 : vector<64x128xi1>, vector<64x128xf32>
    %94 = arith.truncf %93 : vector<64x128xf32> to vector<64x128xbf16>
    %c0_23 = arith.constant 0 : index
    %c0_24 = arith.constant 0 : index
    %95 = vector.load %arg7[%c0_23, %c0_24] : memref<128x64xbf16, #tpu.memory_space<vmem>>, vector<128x64xbf16>
    %cst_25 = arith.constant dense<0.000000e+00> : vector<128x128xf32>
    %96 = tpu.matmul %95, %94, %cst_25 {dimension_numbers = #tpu.dot_dimension_numbers<[1], [0], [0], [1], [0, 0, 1, 1], [], []>} : vector<128x64xbf16>, vector<64x128xbf16>, vector<128x128xf32> -> vector<128x128xf32>
    %c0_26 = arith.constant 0 : index
    %c0_27 = arith.constant 0 : index
    %97 = vector.load %arg9[%c0_26, %c0_27] : memref<128x1xf32, #tpu.memory_space<vmem>>, vector<128x1xf32>
    %98 = vector.broadcast %97 : vector<128x1xf32> to vector<128x128xf32>
    %99 = arith.addf %96, %98 : vector<128x128xf32>
    %100 = arith.addf %99, %10 : vector<128x128xf32>
    %c0_28 = arith.constant 0 : index
    %c0_29 = arith.constant 0 : index
    %c0_30 = arith.constant 0 : index
    %101 = vector.load %arg10[%c0_28, %c0_29, %c0_30] : memref<1x128x128xf32, #tpu.memory_space<vmem>>, vector<1x128x128xf32>
    %102 = vector.shape_cast %101 : vector<1x128x128xf32> to vector<128x128xf32>
    %103 = vector.shape_cast %100 : vector<128x128xf32> to vector<1x128x128xf32>
    tpu.vector_store %arg10[%c0_28, %c0_29, %c0_30], %103 {strides = array<i32>} : memref<1x128x128xf32, #tpu.memory_space<vmem>>, vector<1x128x128xf32>,
    return
  }
  func.func @transform_0(%arg0: i32, %arg1: i32) -> (i32, i32, i32) {
    %c0_i32 = arith.constant 0 : i32
    %c0_i32_0 = arith.constant 0 : i32
    return %arg0, %c0_i32, %arg1 : i32, i32, i32
  }
  func.func @transform_1(%arg0: i32, %arg1: i32) -> (i32, i32, i32, i32) {
    %c0_i32 = arith.constant 0 : i32
    %c0_i32_0 = arith.constant 0 : i32
    %c0_i32_1 = arith.constant 0 : i32
    return %arg0, %arg1, %c0_i32, %c0_i32_0 : i32, i32, i32, i32
  }
  func.func @transform_2(%arg0: i32, %arg1: i32) -> (i32, i32) {
    %c0_i32 = arith.constant 0 : i32
    %c0_i32_0 = arith.constant 0 : i32
    %c0_i32_1 = arith.constant 0 : i32
    return %c0_i32, %c0_i32_0 : i32, i32
  }
  func.func @transform_3(%arg0: i32, %arg1: i32) -> (i32, i32) {
    %c0_i32 = arith.constant 0 : i32
    %c0_i32_0 = arith.constant 0 : i32
    %c0_i32_1 = arith.constant 0 : i32
    return %c0_i32, %c0_i32_0 : i32, i32
  }
  func.func @transform_4(%arg0: i32, %arg1: i32) -> (i32, i32) {
    %c0_i32 = arith.constant 0 : i32
    %c0_i32_0 = arith.constant 0 : i32
    %c0_i32_1 = arith.constant 0 : i32
    return %c0_i32, %c0_i32_0 : i32, i32
  }
  func.func @transform_5(%arg0: i32, %arg1: i32) -> (i32, i32) {
    %c0_i32 = arith.constant 0 : i32
    %c0_i32_0 = arith.constant 0 : i32
    %c0_i32_1 = arith.constant 0 : i32
    return %c0_i32, %c0_i32_0 : i32, i32
  }
  func.func @transform_6(%arg0: i32, %arg1: i32) -> (i32, i32) {
    %c0_i32 = arith.constant 0 : i32
    %c0_i32_0 = arith.constant 0 : i32
    %c0_i32_1 = arith.constant 0 : i32
    return %c0_i32, %c0_i32_0 : i32, i32
  }
  func.func @transform_7(%arg0: i32, %arg1: i32) -> (i32, i32) {
    %c0_i32 = arith.constant 0 : i32
    %c0_i32_0 = arith.constant 0 : i32
    %c0_i32_1 = arith.constant 0 : i32
    return %c0_i32, %c0_i32_0 : i32, i32
  }
  func.func @transform_8(%arg0: i32, %arg1: i32) -> (i32, i32, i32) {
    %c0_i32 = arith.constant 0 : i32
    %c0_i32_0 = arith.constant 0 : i32
    return %arg0, %c0_i32, %arg1 : i32, i32, i32
  }
}

</mosaic_0001>

<bundles_post_ra>
// kernel: tpu_custom_call.1
= control target key start
LH: loop header
LB: loop body
LE: loop exit
PB: predicated region body
PF: predicated region fallthrough
CT: control target
= control target key end

     0   :  { %13 = vsyncpa [#allocation3], 0  ;;  %s4292_s0 = inlined_call_operand.vmem [shape: f32[2,128,128], index: 0, kind: input, shape index: {}]   ;;  %s4293_s1 = inlined_call_operand.vmem [shape: f32[2,1,128,12], index: 1, kind: input, shape index: {}]   ;;  %s4294_s2 = inlined_call_operand.vmem [shape: bf16[64,128], index: 2, kind: input, shape index: {}]   ;;  %s4295_s3 = inlined_call_operand.vmem [shape: bf16[64,448], index: 3, kind: input, shape index: {}]   ;;  %s4296_s4 = inlined_call_operand.vmem [shape: bf16[64,448], index: 4, kind: input, shape index: {}]   ;;  %s4297_s5 = inlined_call_operand.vmem [shape: bf16[128,64], index: 5, kind: input, shape index: {}]   ;;  %s4298_s6 = inlined_call_operand.vmem [shape: f32[64,8], index: 6, kind: input, shape index: {}]   ;;  %s4299_s7 = inlined_call_operand.vmem [shape: f32[128,1], index: 7, kind: input, shape index: {}]   ;;  %s4300_s8 = inlined_call_operand.hbm [shape: f32[2,128,128], index: 8, kind: output, shape index: {}]  }
   0x1   :  { %15 = vsyncpa [#allocation3 + $0x1], 0  ;;  %s2922_s27 = smov 0   ;;  %s2924_s28 = smov 0  }
   0x2   :  { %s2926_s29 = smov 0   ;;  %s2928_s30 = smov 0  }
   0x3   :  { %s2930_s9 = smov 0   ;;  %s2932_s10 = smov 0  }
   0x4 LB: > { %s2329_s11 = sadd.s32 4294967295, %s2857_s10   ;;  %s2330_s12 = sadd.s32 4294967294, %s2857_s10   ;;  %s2857_s10 = sphi %s2932_s10, %s21_s10   ;;  %s2853_s9 = sphi %s2930_s9, %s4312_s9   ;;  %s2849_s30 = sphi %s2928_s30, %s4311_s30   ;;  %s2845_s29 = sphi %s2926_s29, %s4310_s29   ;;  %s2841_s28 = sphi %s2924_s28, %s4309_s28   ;;  %s2837_s27 = sphi %s2922_s27, %s4308_s27  }
   0x5   : > { %s33_s13 = sadd.s32 1, %s2853_s9  ;;  %s224_s14 = sadd.s32 1, %s2845_s29 }
   0x6   : > { %p35_p0 = scmp.ge.s32.totalorder %s33_s13, 2  ;;  %p234_p1 = scmp.ne.s32.totalorder %s2845_s29, %s2841_s28 }
   0x7   : > { %p235_p2 = scmp.eq.s32.totalorder %s2329_s11, 1  ;;  %p240_p3 = scmp.ne.s32.totalorder %s2841_s28, %s2837_s27 }
   0x8   : > { %s4314_s13 = smov (%p35_p0, %s33_s13), 0  ;;  %p241_p5 = scmp.eq.s32.totalorder %s2330_s12, 1 }
   0x9   : > { %p2962_p4 = por %p235_p2, %p234_p1  ;;  %s219_s16 = ssub.s32 %s2853_s9, %s4314_s13 }
   0xa   : > { %p2333_p6 = scmp.ge.s32.totalorder %s2857_s10, 1  ;;  %p222_p7 = scmp.eq.s32.totalorder %s219_s16, 0 }
   0xb   : > { %p2969_p8 = por %p241_p5, %p240_p3  ;;  %p300_p9 = scmp.lt.s32.totalorder %s2857_s10, 3 }
   0xc   : > { %s2975_s18 = scalar_select %p222_p7, %s2845_s29, %s224_s14  }
   0xd   : > { %p301_p10 = pnand %p2333_p6, %p300_p9 }
   0xe   : > { %p346_p11 = scmp.lt.s32.totalorder (!%p301_p10), %s2849_s30, 1  ;;  %s2860_s24 = smov (!%p301_p10), 6  }
   0xf   : > { %304 = sbr.rel (%p301_p10) target bundleno = 1180 (0x49c), region = 52  ;;  %s2865_s22 = smov (!%p301_p10), 122  }
  0x10   : > { %s2868_s26 = smov (!%p301_p10), 118   ;;  %s2870_s11 = smov (!%p301_p10), 120  }
  0x11   : > { %s2871_s12 = smov (!%p301_p10), 116  }
  0x14   : > { %v4301_v0 = vmov 0   ;;  %s2981_s19 = scalar_select %p346_p11, %s2849_s30, 1  ;;  %v371_v25 = vld [vmem:[%s4298_s6 + $0x38] sm:$0xff]  ;;  %v370_v26 = vld [vmem:[%s4298_s6 + $0x30] sm:$0xff]  ;;  %v2861_v27 = vmov 1   ;;  %v2862_v28 = vmov 5  }
  0x15   : > { %2628 = vset.pattern.permute.xlu1 %v4301_v0  ;;  %618 = vmatprep.mubr.bf16.mxu0 %v4301_v0  ;;  %v368_v29 = vld [vmem:[%s4298_s6 + $0x20] sm:$0xff]  ;;  %v369_v30 = vld [vmem:[%s4298_s6 + $0x28] sm:$0xff]  ;;  %v3024_v31 = vld [vmem:[%s4298_s6 + $0x10] sm:$0xff]  ;;  %v2863_v34 = vmov 6   ;;  %v2864_v35 = vmov 3   ;;  %vm444_vm0 = vcmask 48128  }
  0x16   : > { %2627 = vset.pattern.permute.xlu0 %v4301_v0  ;;  %s2436_s20 = sshll.u32 %s2981_s19, 7  ;;  %v367_v32 = vld [vmem:[%s4298_s6 + $0x18] sm:$0xff]  ;;  %v3034_v33 = vld [vmem:[%s4298_s6 + $0x8] sm:$0xff]  ;;  %v3045_v36 = vld [vmem:[%s4298_s6] sm:$0xff] }
  0x17   : > { %s2990_s23 = scalar_lea.vmem %s4292_s0, %s2436_s20  ;;  %s3062_s25 = scalar_lea.vmem %s4293_s1, %s2436_s20 }
  0x18   : > { %v386_v1 = vld [vmem:[%s2990_s23 + $0x70] sm:$0xff]  ;;  %v387_v2 = vld [vmem:[%s2990_s23 + $0x78] sm:$0xff]  ;;  %v384_v3 = vld [vmem:[%s2990_s23 + $0x60] sm:$0xff] }
  0x19   : > { %v419_v4 = vpack.c.bf16 %v387_v2, %v386_v1  ;;  %v385_v5 = vld [vmem:[%s2990_s23 + $0x68] sm:$0xff]  ;;  %v382_v6 = vld [vmem:[%s2990_s23 + $0x50] sm:$0xff]  ;;  %v383_v7 = vld [vmem:[%s2990_s23 + $0x58] sm:$0xff] }
  0x1a   : > { %v417_v8 = vpack.c.bf16 %v383_v7, %v382_v6  ;;  %v380_v9 = vld [vmem:[%s2990_s23 + $0x40] sm:$0xff]  ;;  %v381_v10 = vld [vmem:[%s2990_s23 + $0x48] sm:$0xff]  ;;  %v418_v11 = vpack.c.bf16 %v385_v5, %v384_v3  ;;  %v378_v13 = vld [vmem:[%s2990_s23 + $0x30] sm:$0xff] }
  0x1b   : > { %442 = vrot.lane.b32.xlu0 %v419_v4, %s2860_s24  ;;  %v416_v12 = vpack.c.bf16 %v381_v10, %v380_v9  ;;  %v379_v14 = vld [vmem:[%s2990_s23 + $0x38] sm:$0xff]  ;;  %v376_v15 = vld [vmem:[%s2990_s23 + $0x20] sm:$0xff]  ;;  %v377_v16 = vld [vmem:[%s2990_s23 + $0x28] sm:$0xff] }
  0x1c   : > { %438 = vrot.lane.b32.xlu1 %v417_v8, %s2860_s24  ;;  %v415_v17 = vpack.c.bf16 %v379_v14, %v378_v13  ;;  %v414_v18 = vpack.c.bf16 %v377_v16, %v376_v15  ;;  %v374_v19 = vld [vmem:[%s2990_s23 + $0x10] sm:$0xff]  ;;  %v375_v20 = vld [vmem:[%s2990_s23 + $0x18] sm:$0xff]  ;;  %v372_v21 = vld [vmem:[%s2990_s23] sm:$0xff] }
  0x1d   : > { %v373_v22 = vld [vmem:[%s2990_s23 + $0x8] sm:$0xff]  ;;  %v413_v23 = vpack.c.bf16 %v375_v20, %v374_v19  ;;  %v402_v37 = vld [vmem:[%s3062_s25 + $0x70] sm:$0xff]  ;;  %v403_v38 = vld [vmem:[%s3062_s25 + $0x78] sm:$0xff] }
  0x1e   : > { %v412_v24 = vpack.c.bf16 %v373_v22, %v372_v21  ;;  %v411_v39 = vpack.c.bf16 %v403_v38, %v402_v37  ;;  %v400_v40 = vld [vmem:[%s3062_s25 + $0x60] sm:$0xff]  ;;  %v401_v41 = vld [vmem:[%s3062_s25 + $0x68] sm:$0xff]  ;;  %v398_v42 = vld [vmem:[%s3062_s25 + $0x50] sm:$0xff] }
  0x1f   : > { %440 = vrot.lane.b32.xlu0 %v418_v11, %s2860_s24  ;;  %v399_v43 = vld [vmem:[%s3062_s25 + $0x58] sm:$0xff]  ;;  %v410_v47 = vpack.c.bf16 %v401_v41, %v400_v40  ;;  %v396_v50 = vld [vmem:[%s3062_s25 + $0x40] sm:$0xff]  ;;  %v397_v51 = vld [vmem:[%s3062_s25 + $0x48] sm:$0xff] }
  0x20   : > { %436 = vrot.lane.b32.xlu1 %v416_v12, %s2860_s24  ;;  %v409_v49 = vpack.c.bf16 %v399_v43, %v398_v42  ;;  %v408_v56 = vpack.c.bf16 %v397_v51, %v396_v50  ;;  %v394_v58 = vld [vmem:[%s3062_s25 + $0x30] sm:$0xff]  ;;  %v395_v59 = vld [vmem:[%s3062_s25 + $0x38] sm:$0xff]  ;;  %v392_v1 = vld [vmem:[%s3062_s25 + $0x20] sm:$0xff] }
  0x21   : > { %v407_v62 = vpack.c.bf16 %v395_v59, %v394_v58  ;;  %v393_v2 = vld [vmem:[%s3062_s25 + $0x28] sm:$0xff]  ;;  %v390_v7 = vld [vmem:[%s3062_s25 + $0x10] sm:$0xff]  ;;  %v391_v8 = vld [vmem:[%s3062_s25 + $0x18] sm:$0xff] }
  0x22   : > { %v406_v5 = vpack.c.bf16 %v393_v2, %v392_v1  ;;  %v405_v11 = vpack.c.bf16 %v391_v8, %v390_v7  ;;  %v388_v13 = vld [vmem:[%s3062_s25] sm:$0xff]  ;;  %v389_v14 = vld [vmem:[%s3062_s25 + $0x8] sm:$0xff]  ;;  %s2867_s25 = smov 124  }
  0x23   : > { %434 = vrot.lane.b32.xlu0 %v415_v17, %s2860_s24  ;;  %v404_v17 = vpack.c.bf16 %v389_v14, %v388_v13  ;;  %v2665_v22 = vld [vmem:[%s4294_s2] sm:$0xff]  }
  0x24   : > { %432 = vrot.lane.b32.xlu1 %v414_v18, %s2860_s24 }
  0x27   : > { %430 = vrot.lane.b32.xlu0 %v413_v23, %s2860_s24  ;;  %v2666_v23 = vld [vmem:[%s4294_s2 + $0x8] sm:$0xff]  }
  0x28   : > { %428 = vrot.lane.b32.xlu1 %v412_v24, %s2860_s24  ;;  %v2667_v24 = vld [vmem:[%s4294_s2 + $0x10] sm:$0xff]   ;;  %s2866_s24 = smov 126  }
  0x2b   : > { %554 = vperm.xlu0 %2627, %v370_v26  }
  0x2c   : > { %559 = vperm.xlu1 %2628, %v371_v25  }
  0x2f   : > { %2631 = vset.pattern.permute.xlu0 %v2861_v27 }
  0x30   : > { %2629 = vset.pattern.permute.xlu1 %v2862_v28  ;;  %764 = vperm.xlu0 %2631, %v370_v26  }
  0x31   : > { %700 = vperm.xlu1 %2629, %v370_v26  }
  0x34   : > { %756 = vperm.xlu0 %2631, %v368_v29  }
  0x35   : > { %2630 = vset.pattern.permute.xlu1 %v4301_v0 }
  0x36   : > { %544 = vperm.xlu1 %2630, %v368_v29  }
  0x38   : > { %748 = vperm.xlu0 %2631, %v3024_v31  }
  0x3a   : > { %549 = vperm.xlu1 %2630, %v369_v30  }
  0x3c   : > { %2638 = vset.pattern.permute.xlu0 %v2862_v28 }
  0x3d   : > { %704 = vperm.xlu0 %2638, %v371_v25  }
  0x3e   : > { %2632 = vset.pattern.permute.xlu1 %v2861_v27 }
  0x3f   : > { %768 = vperm.xlu1 %2632, %v371_v25  }
  0x41   : > { %696 = vperm.xlu0 %2638, %v369_v30  }
  0x43   : > { %2633 = vset.pattern.permute.xlu1 %v2862_v28 }
  0x44   : > { %692 = vperm.xlu1 %2633, %v368_v29  }
  0x45   : > { %688 = vperm.xlu0 %2638, %v367_v32  }
  0x48   : > { %2634 = vset.pattern.permute.xlu1 %v4301_v0 }
  0x49   : > { %534 = vperm.xlu1 %2634, %v3024_v31   ;;  %680 = vperm.xlu0 %2638, %v3034_v33  }
  0x4d   : > { %539 = vperm.xlu1 %2634, %v367_v32   ;;  %2642 = vset.pattern.permute.xlu0 %v2863_v34 }
  0x4e   : > { %1265 = vperm.xlu0 %2642, %v370_v26  }
  0x51   : > { %2635 = vset.pattern.permute.xlu1 %v2861_v27 }
  0x52   : > { %760 = vperm.xlu1 %2635, %v369_v30   ;;  %1249 = vperm.xlu0 %2642, %v3024_v31  }
  0x56   : > { %2636 = vset.pattern.permute.xlu1 %v2862_v28  ;;  %2647 = vset.pattern.permute.xlu0 %v2864_v35 }
  0x57   : > { %684 = vperm.xlu1 %2636, %v3024_v31   ;;  %1333 = vperm.xlu0 %2647, %v371_v25  }
  0x5b   : > { %2637 = vset.pattern.permute.xlu1 %v4301_v0  ;;  %1321 = vperm.xlu0 %2647, %v368_v29  }
  0x5c   : > { %524 = vperm.xlu1 %2637, %v3045_v36  }
  0x5f   : > { %1317 = vperm.xlu0 %2647, %v367_v32  }
  0x60   : > { %529 = vperm.xlu1 %2637, %v3034_v33  }
  0x63   : > { %1305 = vperm.xlu0 %2647, %v3045_v36  }
  0x64   : > { %2639 = vset.pattern.permute.xlu1 %v2861_v27 }
  0x65   : > { %752 = vperm.xlu1 %2639, %v367_v32  }
  0x69   : > { %2640 = vset.pattern.permute.xlu1 %v2862_v28 }
  0x6a   : > { %676 = vperm.xlu1 %2640, %v3045_v36  }
  0x6e   : > { %2641 = vset.pattern.permute.xlu1 %v2861_v27 }
  0x6f   : > { %740 = vperm.xlu1 %2641, %v3045_v36  }
  0x73   : > { %744 = vperm.xlu1 %2641, %v3034_v33  }
  0x77   : > { %2643 = vset.pattern.permute.xlu1 %v2863_v34 }
  0x78   : > { %1269 = vperm.xlu1 %2643, %v371_v25   ;;  %v2668_v25 = vld [vmem:[%s4294_s2 + $0x18] sm:$0xff]  }
  0x7c   : > { %2644 = vset.pattern.permute.xlu1 %v2864_v35 }
  0x7d   : > { %1329 = vperm.xlu1 %2644, %v370_v26  }
  0x81   : > { %2645 = vset.pattern.permute.xlu1 %v2863_v34 }
  0x82   : > { %1257 = vperm.xlu1 %2645, %v368_v29  }
  0x86   : > { %1261 = vperm.xlu1 %2645, %v369_v30  }
  0x8a   : > { %2646 = vset.pattern.permute.xlu1 %v2864_v35 }
  0x8b   : > { %1325 = vperm.xlu1 %2646, %v369_v30  }
  0x8d   : > { %v443_v44 = vpop.permute.xlu0 %442 }
  0x8e   : > { %v491_v45 = vsel %vm444_vm0, %v443_v44, %v411_v39  ;;  %v475_v46 = vsel %vm444_vm0, %v411_v39, %v443_v44  ;;  %v439_v48 = vpop.permute.xlu1 %438 }
  0x8f   : > { %586 = vmatprep.subr.bf16.mxu0 %v491_v45  ;;  %2648 = vset.pattern.permute.xlu1 %v2863_v34  ;;  %v487_v55 = vsel %vm444_vm0, %v439_v48, %v409_v49  ;;  %v467_v60 = vsel %vm444_vm0, %v409_v49, %v439_v48 }
  0x90   : > { %587 = vmatpush1.bf16.msra.mxu0 %v475_v46  ;;  %1253 = vperm.xlu1 %2648, %v367_v32  }
  0x91   : > { %v441_v52 = vpop.permute.xlu0 %440 }
  0x92   : > { %v489_v53 = vsel %vm444_vm0, %v441_v52, %v410_v47  ;;  %v471_v54 = vsel %vm444_vm0, %v410_v47, %v441_v52  ;;  %v437_v57 = vpop.permute.xlu1 %436 }
  0x93   : > { %588 = vmatprep.subr.bf16.mxu0 %v489_v53  ;;  %v485_v61 = vsel %vm444_vm0, %v437_v57, %v408_v56  ;;  %v463_v3 = vsel %vm444_vm0, %v408_v56, %v437_v57 }
  0x94   : > { %589 = vmatpush1.bf16.msra.mxu0 %v471_v54  ;;  %2649 = vset.pattern.permute.xlu1 %v2864_v35 }
  0x95   : > { %590 = vmatprep.subr.bf16.mxu0 %v487_v55  ;;  %1313 = vperm.xlu1 %2649, %v3024_v31   ;;  %v435_v63 = vpop.permute.xlu0 %434 }
  0x96   : > { %v483_v4 = vsel %vm444_vm0, %v435_v63, %v407_v62  ;;  %v433_v6 = vpop.permute.xlu1 %432  ;;  %v459_v9 = vsel %vm444_vm0, %v407_v62, %v435_v63 }
  0x97   : > { %v481_v10 = vsel %vm444_vm0, %v433_v6, %v406_v5  ;;  %v455_v15 = vsel %vm444_vm0, %v406_v5, %v433_v6 }
  0x98   : > { %591 = vmatpush1.bf16.msra.mxu0 %v467_v60 }
  0x99   : > { %592 = vmatprep.subr.bf16.mxu0 %v485_v61  ;;  %2650 = vset.pattern.permute.xlu1 %v2863_v34  ;;  %v431_v12 = vpop.permute.xlu0 %430  ;;  %v493_v61 = vlaneseq }
  0x9a   : > { %1241 = vperm.xlu1 %2650, %v3045_v36   ;;  %v479_v16 = vsel %vm444_vm0, %v431_v12, %v405_v11  ;;  %v429_v18 = vpop.permute.xlu1 %428  ;;  %v451_v19 = vsel %vm444_vm0, %v405_v11, %v431_v12 }
  0x9b   : > { %v477_v20 = vsel %vm444_vm0, %v429_v18, %v404_v17  ;;  %v447_v21 = vsel %vm444_vm0, %v404_v17, %v429_v18  ;;  %v3183_v1 = vand.u32 127, %v493_v61 }
  0x9c   : > { %593 = vmatpush1.bf16.msra.mxu0 %v463_v3 }
  0x9d   : > { %594 = vmatprep.subr.bf16.mxu0 %v483_v4  ;;  %v3186_v5 = vadd.s32 128, %v3183_v1  ;;  %vm496_vm3 = vcmp.ge.s32.totalorder %v3183_v1, 6 }
  0x9e   : > { %1245 = vperm.xlu1 %2650, %v3034_v33  }
  0x9f   : > { %vm505_vm4 = vcmp.lt.s32.totalorder %v3186_v5, 134 }
  0xa0   : > { %595 = vmatpush1.bf16.msra.mxu0 %v459_v9 }
  0xa1   : > { %596 = vmatprep.subr.bf16.mxu0 %v481_v10 }
  0xa2   : > { %2651 = vset.pattern.permute.xlu1 %v2864_v35 }
  0xa3   : > { %1309 = vperm.xlu1 %2651, %v3034_v33  }
  0xa4   : > { %597 = vmatpush1.bf16.msra.mxu0 %v455_v15 }
  0xa5   : > { %598 = vmatprep.subr.bf16.mxu0 %v479_v16 }
  0xa6   : > { %v3141_v37 = vpop.permute.xlu0 %554 }
  0xa7   : > { %v3121_v26 = vpop.permute.xlu1 %559 }
  0xa8   : > { %599 = vmatpush1.bf16.msra.mxu0 %v451_v19 }
  0xa9   : > { %600 = vmatprep.subr.bf16.mxu0 %v477_v20 }
  0xab   : > { %v3143_v39 = vpop.permute.xlu0 %764 }
  0xac   : > { %601 = vmatpush1.bf16.msra.mxu0 %v447_v21  ;;  %v3123_v27 = vpop.permute.xlu1 %700 }
  0xad   : > { %1175 = vmatprep.subr.bf16.mxu0 %v4301_v0 }
  0xaf   : > { %619 = vmatmul.mubr.bf16.vlgmr.msra.gmra.mxu0 %v2665_v22  ;;  %v3147_v41 = vpop.permute.xlu0 %756 }
  0xb0   : > { %628 = vmatprep.mubr.bf16.mxu0 %v4301_v0 }
  0xb1   : > { %v3125_v28 = vpop.permute.xlu1 %544 }
  0xb3   : > { %v3149_v43 = vpop.permute.xlu0 %748 }
  0xb5   : > { %v3127_v29 = vpop.permute.xlu1 %549 }
  0xb7   : > { %629 = vmatmul.mubr.bf16.gmra.mxu0 %v2666_v23 }
  0xb8   : > { %638 = vmatprep.mubr.bf16.mxu0 %v4301_v0  ;;  %v3151_v45 = vpop.permute.xlu0 %704 }
  0xba   : > { %v3129_v30 = vpop.permute.xlu1 %768 }
  0xbc   : > { %v3155_v47 = vpop.permute.xlu0 %696 }
  0xbf   : > { %639 = vmatmul.mubr.bf16.gmra.mxu0 %v2667_v24  ;;  %v3131_v31 = vpop.permute.xlu1 %692 }
  0xc0   : > { %648 = vmatprep.mubr.bf16.mxu0 %v4301_v0  ;;  %v3159_v49 = vpop.permute.xlu0 %688 }
  0xc4   : > { %v3133_v32 = vpop.permute.xlu1 %534  ;;  %v681_v51 = vpop.permute.xlu0 %680 }
  0xc7   : > { %649 = vmatmul.mubr.bf16.gmra.mxu0 %v2668_v25 }
  0xc8   : > { %v3135_v33 = vpop.permute.xlu1 %539 }
  0xc9   : > { %v3165_v53 = vpop.permute.xlu0 %1265 }
  0xcd   : > { %v3137_v34 = vpop.permute.xlu1 %760  ;;  %v3169_v55 = vpop.permute.xlu0 %1249 }
  0xd2   : > { %v3139_v35 = vpop.permute.xlu1 %684  ;;  %v3173_v57 = vpop.permute.xlu0 %1333 }
  0xd6   : > { %v3177_v59 = vpop.permute.xlu0 %1321 }
  0xd7   : > { %v525_v36 = vpop.permute.xlu1 %524 }
  0xda   : > { %v3181_v62 = vpop.permute.xlu0 %1317 }
  0xdb   : > { %v530_v38 = vpop.permute.xlu1 %529 }
  0xde   : > { %v1306_v9 = vpop.permute.xlu0 %1305 }
  0xe0   : > { %v3145_v40 = vpop.permute.xlu1 %752 }
  0xe5   : > { %v677_v42 = vpop.permute.xlu1 %676 }
  0xea   : > { %v741_v44 = vpop.permute.xlu1 %740 }
  0xee   : > { %v3153_v46 = vpop.permute.xlu1 %744 }
  0xf3   : > { %v3157_v48 = vpop.permute.xlu1 %1269 }
  0xf8   : > { %v3161_v50 = vpop.permute.xlu1 %1329 }
  0xfd   : > { %v3163_v52 = vpop.permute.xlu1 %1257 }
 0x101   : > { %v3167_v54 = vpop.permute.xlu1 %1261 }
 0x106   : > { %v3171_v56 = vpop.permute.xlu1 %1325 }
 0x10b   : > { %v3175_v58 = vpop.permute.xlu1 %1253 }
 0x110   : > { %v3179_v60 = vpop.permute.xlu1 %1313 }
 0x115   : > { %v1242_v63 = vpop.permute.xlu1 %1241 }
 0x119   : > { %v1246_v11 = vpop.permute.xlu1 %1245 }
 0x16f   : > { %v620_v2 = vpop.f32.mrf.mxu0 }
 0x170   : > { %v621_v3 = vadd.f32 %v620_v2, %v525_v36 }
 0x171   : > { %v622_v4 = vpop.f32.mrf.mxu0 }
 0x172   : > { %v707_v6 = vmul.f32 %v677_v42, %v621_v3  ;;  %v1272_v7 = vmul.f32 %v1242_v63, %v621_v3  ;;  %v623_v8 = vadd.f32 %v622_v4, %v525_v36  ;;  %vm659_vm1 = vcmp.gt.f32.partialorder %v621_v3, 0.0  ;;  %v1310_v4 = vpop.permute.xlu1 %1309 }
 0x173   : > { %v624_v10 = vpop.f32.mrf.mxu0 }
 0x174   : > { %v708_v12 = vmul.f32 %v677_v42, %v623_v8  ;;  %v625_v13 = vadd.f32 %v624_v10, %v530_v38  ;;  %vm660_vm2 = vcmp.gt.f32.partialorder %v623_v8, 0.0  ;;  %v723_v14 = vsel %vm659_vm1, %v621_v3, %v707_v6 }
 0x175   : > { %v1273_v15 = vmul.f32 %v1242_v63, %v623_v8  ;;  %v1288_v16 = vsel %vm659_vm1, %v621_v3, %v1272_v7  ;;  %v626_v17 = vpop.f32.mrf.mxu0  ;;  %v3192_v21 = vadd.f32 %v741_v44, %v723_v14 }
 0x176   : > { %v709_v18 = vmul.f32 %v681_v51, %v625_v13  ;;  %v724_v19 = vsel %vm660_vm2, %v623_v8, %v708_v12  ;;  %v3190_v20 = vadd.f32 %v1306_v9, %v1288_v16  ;;  %v1274_v23 = vmul.f32 %v1246_v11, %v625_v13 }
 0x177   : > { %v1289_v22 = vsel %vm660_vm2, %v623_v8, %v1273_v15  ;;  %v627_v24 = vadd.f32 %v626_v17, %v530_v38  ;;  %v630_v25 = vpop.f32.mrf.mxu0  ;;  %v772_v36 = vadd.f32 %v741_v44, %v724_v19  ;;  %vm661_vm5 = vcmp.gt.f32.partialorder %v625_v13, 0.0 }
 0x178   : > { %v1337_v42 = vadd.f32 %v1306_v9, %v1289_v22  ;;  %v1352_v61 = vsel %vm496_vm3, %v3190_v20, 0.0  ;;  %v3198_v2 = vadd.f32 %v630_v25, %v3133_v32  ;;  %v725_v3 = vsel %vm661_vm5, %v625_v13, %v709_v18 }
 0x179   : > { %v710_v63 = vmul.f32 %v681_v51, %v627_v24  ;;  %vm662_vm6 = vcmp.gt.f32.partialorder %v627_v24, 0.0  ;;  %v632_v6 = vpop.f32.mrf.mxu0  ;;  %v3204_v44 = vadd.f32 %v3153_v46, %v725_v3  ;;  %v1275_v8 = vmul.f32 %v1246_v11, %v627_v24 }
 0x17a   : > { %v1353_v7 = vsel %vm505_vm4, %v1337_v42, 0.0  ;;  %v1290_v9 = vsel %vm661_vm5, %v625_v13, %v1274_v23  ;;  %v791_v51 = vsel %vm496_vm3, %v3192_v21, 0.0  ;;  %v792_v15 = vsel %vm505_vm4, %v772_v36, 0.0 }
 0x17b   : > { %v726_v38 = vsel %vm662_vm6, %v627_v24, %v710_v63  ;;  %v634_v10 = vpop.f32.mrf.mxu0  ;;  %v3210_v14 = vadd.f32 %v1310_v4, %v1290_v9  ;;  %v711_v16 = vmul.f32 %v3139_v35, %v3198_v2  ;;  %v793_v11 = vsel %vm496_vm3, %v3204_v44, 0.0 }
 0x17c   : > { %v774_v12 = vadd.f32 %v3153_v46, %v726_v38  ;;  %v1291_v13 = vsel %vm662_vm6, %v627_v24, %v1275_v8  ;;  %v3222_v19 = vpack.c.bf16 %v793_v11, %v791_v51  ;;  %vm663_vm7 = vcmp.gt.f32.partialorder %v3198_v2, 0.0 }
 0x17d   : > { %v636_v17 = vpop.f32.mrf.mxu0  ;;  %v1339_v46 = vadd.f32 %v1310_v4, %v1291_v13  ;;  %v1354_v22 = vsel %vm496_vm3, %v3210_v14, 0.0  ;;  %v2401_v42 = vpack.c.bf16 %v3210_v14, %v3190_v20  ;;  %v3237_v63 = vadd.f32 %v632_v6, %v3133_v32 }
 0x17e   : > { %v794_v18 = vsel %vm505_vm4, %v774_v12, 0.0  ;;  %v3230_v25 = vpack.c.bf16 %v1354_v22, %v1352_v61  ;;  %v3240_v3 = vadd.f32 %v634_v10, %v3135_v33  ;;  %873 = vrot.lane.b32.xlu0 %v3222_v19, %s2865_s22  ;;  %v3247_v61 = vadd.f32 %v636_v17, %v3135_v33 }
 0x17f   : > { %v3228_v23 = vpack.c.bf16 %v794_v18, %v792_v15  ;;  %v640_v36 = vpop.f32.mrf.mxu0  ;;  %v1355_v24 = vsel %vm505_vm4, %v1339_v46, 0.0  ;;  %v727_v32 = vsel %vm663_vm7, %v3198_v2, %v711_v16  ;;  %vm664_vm8 = vcmp.gt.f32.partialorder %v3237_v63, 0.0 }
 0x180   : > { %v3244_v4 = vpack.c.bf16 %v1355_v24, %v1353_v7  ;;  %v712_v6 = vmul.f32 %v3139_v35, %v3237_v63  ;;  %vm665_vm9 = vcmp.gt.f32.partialorder %v3240_v3, 0.0  ;;  %v713_v7 = vmul.f32 %v3159_v49, %v3240_v3 }
 0x181   : > { %875 = vrot.lane.b32.xlu1 %v3228_v23, %s2865_s22  ;;  %v642_v38 = vpop.f32.mrf.mxu0  ;;  %vm666_vm10 = vcmp.gt.f32.partialorder %v3247_v61, 0.0  ;;  %v714_v33 = vmul.f32 %v3159_v49, %v3247_v61  ;;  %v3269_v35 = vadd.f32 %v3149_v43, %v727_v32  ;;  %v3284_v16 = vadd.f32 %v640_v36, %v3125_v28 }
 0x182   : > { %v728_v9 = vsel %vm664_vm8, %v3237_v63, %v712_v6  ;;  %823 = vrot.lane.b32.xlu0 %v3222_v19, %s2866_s24  ;;  %v729_v10 = vsel %vm665_vm9, %v3240_v3, %v713_v7  ;;  %v643_v24 = vadd.f32 %v642_v38, %v3125_v28  ;;  %vm839_vm5 = vcmask 1031168  }
 0x183   : > { %v644_v8 = vpop.f32.mrf.mxu0  ;;  %v776_v51 = vadd.f32 %v3149_v43, %v728_v9  ;;  %v3278_v12 = vadd.f32 %v3145_v40, %v729_v10  ;;  %v730_v15 = vsel %vm666_vm10, %v3247_v61, %v714_v33  ;;  %v795_v17 = vsel %vm496_vm3, %v3269_v35, 0.0 }
 0x184   : > { %v778_v11 = vadd.f32 %v3145_v40, %v730_v15  ;;  %v715_v22 = vmul.f32 %v3131_v31, %v3284_v16  ;;  %vm667_vm11 = vcmp.gt.f32.partialorder %v3284_v16, 0.0  ;;  %v645_v32 = vadd.f32 %v644_v8, %v3127_v29 }
 0x185   : > { %825 = vrot.lane.b32.xlu1 %v3228_v23, %s2866_s24  ;;  %v646_v49 = vpop.f32.mrf.mxu0  ;;  %v797_v13 = vsel %vm496_vm3, %v3278_v12, 0.0  ;;  %v796_v40 = vsel %vm505_vm4, %v776_v51, 0.0  ;;  %vm668_vm12 = vcmp.gt.f32.partialorder %v643_v24, 0.0  ;;  %v716_v33 = vmul.f32 %v3131_v31, %v643_v24 }
 0x186   : > { %848 = vrot.lane.b32.xlu0 %v3222_v19, %s2867_s25  ;;  %v798_v18 = vsel %vm505_vm4, %v778_v11, 0.0  ;;  %v3301_v46 = vpack.c.bf16 %v797_v13, %v795_v17  ;;  %v647_v6 = vadd.f32 %v646_v49, %v3127_v29  ;;  %v731_v9 = vsel %vm667_vm11, %v3284_v16, %v715_v22 }
 0x187   : > { %v650_v43 = vpop.f32.mrf.mxu0  ;;  %v3305_v36 = vpack.c.bf16 %v798_v18, %v796_v40  ;;  %vm669_vm13 = vcmp.gt.f32.partialorder %v645_v32, 0.0  ;;  %v717_v28 = vmul.f32 %v3155_v47, %v645_v32  ;;  %v732_v38 = vsel %vm668_vm12, %v643_v24, %v716_v33 }
 0x188   : > { %vm670_vm14 = vcmp.gt.f32.partialorder %v647_v6, 0.0  ;;  %v718_v29 = vmul.f32 %v3155_v47, %v647_v6  ;;  %v651_v10 = vadd.f32 %v650_v43, %v3141_v37  ;;  %v3327_v49 = vadd.f32 %v3147_v41, %v731_v9 }
 0x189   : > { %850 = vrot.lane.b32.xlu1 %v3228_v23, %s2867_s25  ;;  %v652_v7 = vpop.f32.mrf.mxu0  ;;  %v733_v8 = vsel %vm669_vm13, %v645_v32, %v717_v28  ;;  %v780_v47 = vadd.f32 %v3147_v41, %v732_v38  ;;  %v1282_v11 = vmul.f32 %v3167_v54, %v645_v32  ;;  %v1276_v43 = vmul.f32 %v3169_v55, %v3198_v2 }
 0x18a   : > { %877 = vrot.lane.b32.xlu0 %v3301_v46, %s2865_s22  ;;  %v3330_v51 = vadd.f32 %v3137_v34, %v733_v8  ;;  %v734_v15 = vsel %vm670_vm14, %v647_v6, %v718_v29  ;;  %v1278_v40 = vmul.f32 %v3175_v58, %v3240_v3  ;;  %v1283_v41 = vmul.f32 %v3167_v54, %v647_v6 }
 0x18b   : > { %v654_v31 = vpop.f32.mrf.mxu0  ;;  %v782_v13 = vadd.f32 %v3137_v34, %v734_v15  ;;  %v719_v33 = vmul.f32 %v3123_v27, %v651_v10  ;;  %v799_v34 = vsel %vm496_vm3, %v3327_v49, 0.0  ;;  %v1280_v9 = vmul.f32 %v3163_v52, %v3284_v16 }
 0x18c   : > { %v801_v17 = vsel %vm496_vm3, %v3330_v51, 0.0  ;;  %v655_v18 = vadd.f32 %v654_v31, %v3121_v26  ;;  %v1281_v28 = vmul.f32 %v3163_v52, %v643_v24  ;;  %vm671_vm15 = vcmp.gt.f32.partialorder %v651_v10, 0.0 }
 0x18d   : > { %879 = vrot.lane.b32.xlu1 %v3305_v36, %s2865_s22  ;;  %v802_v22 = vsel %vm505_vm4, %v782_v13, 0.0  ;;  %v800_v54 = vsel %vm505_vm4, %v780_v47, 0.0  ;;  %v3362_v38 = vpack.c.bf16 %v801_v17, %v799_v34  ;;  %v1298_v29 = vsel %vm669_vm13, %v645_v32, %v1282_v11  ;;  %v656_v13 = vpop.f32.mrf.mxu0 }
 0x18e   : > { %827 = vrot.lane.b32.xlu0 %v3301_v46, %s2866_s24  ;;  %v3365_v8 = vpack.c.bf16 %v802_v22, %v800_v54  ;;  %v1284_v31 = vmul.f32 %v3165_v53, %v651_v10  ;;  %vm673_vm0 = vcmp.gt.f32.partialorder %v655_v18, 0.0  ;;  %v721_v15 = vmul.f32 %v3151_v45, %v655_v18 }
 0x18f   : > { %v1292_v52 = vsel %vm663_vm7, %v3198_v2, %v1276_v43  ;;  %v1299_v0 = vsel %vm670_vm14, %v647_v6, %v1283_v41  ;;  %v735_v47 = vsel %vm671_vm15, %v651_v10, %v719_v33  ;;  %v1286_v17 = vmul.f32 %v3157_v48, %v655_v18  ;;  %vm3725_vm7 = vmpackc.low %vm496_vm3, %vm496_vm3 }
 0x190   : > { %v1294_v32 = vsel %vm665_vm9, %v3240_v3, %v1278_v40  ;;  %v1296_v11 = vsel %vm667_vm11, %v3284_v16, %v1280_v9  ;;  %v1297_v22 = vsel %vm668_vm12, %v643_v24, %v1281_v28  ;;  %v737_v2 = vsel %vm673_vm0, %v655_v18, %v721_v15 }
 0x191   : > { %829 = vrot.lane.b32.xlu1 %v3305_v36, %s2866_s24  ;;  %v3387_v6 = vadd.f32 %v3171_v56, %v1298_v29  ;;  %v3390_v43 = vadd.f32 %v3129_v30, %v737_v2  ;;  %v1302_v41 = vsel %vm673_vm0, %v655_v18, %v1286_v17  ;;  %v3393_v33 = vadd.f32 %v656_v13, %v3121_v26 }
 0x192   : > { %852 = vrot.lane.b32.xlu0 %v3301_v46, %s2867_s25  ;;  %v1347_v3 = vadd.f32 %v3171_v56, %v1299_v0  ;;  %v3397_v16 = vadd.f32 %v3143_v39, %v735_v47  ;;  %v1300_v24 = vsel %vm671_vm15, %v651_v10, %v1284_v31  ;;  %v3401_v40 = vadd.f32 %v652_v7, %v3141_v37 }
 0x193   : > { %v3404_v34 = vadd.f32 %v3179_v60, %v1292_v52  ;;  %v3407_v9 = vadd.f32 %v3181_v62, %v1294_v32  ;;  %v3410_v18 = vadd.f32 %v3173_v57, %v1302_v41  ;;  %v3415_v0 = vadd.f32 %v3177_v59, %v1296_v11 }
 0x194   : > { %v1345_v26 = vadd.f32 %v3177_v59, %v1297_v22  ;;  %v722_v37 = vmul.f32 %v3151_v45, %v3393_v33  ;;  %v2360_v56 = vpack.c.bf16 %v3390_v43, %v3397_v16  ;;  %v1362_v7 = vsel %vm496_vm3, %v3387_v6, 0.0 }
 0x195   : > { %854 = vrot.lane.b32.xlu1 %v3305_v36, %s2867_s25  ;;  %v3428_v10 = vadd.f32 %v3161_v50, %v1300_v24  ;;  %vm674_vm1 = vcmp.gt.f32.partialorder %v3393_v33, 0.0  ;;  %v2363_v59 = vpack.c.bf16 %v3330_v51, %v3327_v49  ;;  %v1363_v45 = vsel %vm505_vm4, %v1347_v3, 0.0 }
 0x196   : > { %881 = vrot.lane.b32.xlu0 %v3362_v38, %s2865_s22  ;;  %v720_v28 = vmul.f32 %v3123_v27, %v3401_v40  ;;  %v2366_v54 = vpack.c.bf16 %v3278_v12, %v3269_v35  ;;  %v2369_v29 = vpack.c.bf16 %v3204_v44, %v3192_v21  ;;  %vm672_vm2 = vcmp.gt.f32.partialorder %v3401_v40, 0.0  ;;  %v2672_v35 = vld [vmem:[%s4295_s3 + $0x24] ss:$16 sps:$4 sm:$0xff]   ;;  %v3789_v12 = vld [vmem:[%s4298_s6 + $0x38] sm:$0xff]  ;;  %v3796_v21 = vld [vmem:[%s4298_s6 + $0x28] sm:$0xff] }
 0x197   : > { %v2392_v31 = vpack.c.bf16 %v3410_v18, %v3428_v10  ;;  %v2395_v15 = vpack.c.bf16 %v3387_v6, %v3415_v0  ;;  %v2398_v27 = vpack.c.bf16 %v3407_v9, %v3404_v34  ;;  %v1360_v13 = vsel %vm496_vm3, %v3415_v0, 0.0 }
 0x198   : > { %v738_v52 = vsel %vm674_vm1, %v3393_v33, %v722_v37  ;;  %v1361_v47 = vsel %vm505_vm4, %v1345_v26, 0.0  ;;  %v3460_v17 = vpack.c.bf16 %v1362_v7, %v1360_v13  ;;  %v736_v11 = vsel %vm672_vm2, %v3401_v40, %v720_v28 }
 0x199   : > { %883 = vrot.lane.b32.xlu1 %v3365_v8, %s2865_s22  ;;  %v3462_v32 = vpack.c.bf16 %v1363_v45, %v1361_v47  ;;  %v786_v22 = vadd.f32 %v3129_v30, %v738_v52  ;;  %v1279_v2 = vmul.f32 %v3175_v58, %v3247_v61  ;;  %v784_v41 = vadd.f32 %v3143_v39, %v736_v11 }
 0x19a   : > { %831 = vrot.lane.b32.xlu0 %v3362_v38, %s2866_s24  ;;  %v1277_v3 = vmul.f32 %v3169_v55, %v3237_v63  ;;  %v805_v24 = vsel %vm496_vm3, %v3390_v43, 0.0  ;;  %v803_v39 = vsel %vm496_vm3, %v3397_v16, 0.0  ;;  %v1358_v28 = vsel %vm496_vm3, %v3407_v9, 0.0 }
 0x19b   : > { %v806_v30 = vsel %vm505_vm4, %v786_v22, 0.0  ;;  %v1295_v58 = vsel %vm666_vm10, %v3247_v61, %v1279_v2  ;;  %v804_v55 = vsel %vm505_vm4, %v784_v41, 0.0  ;;  %v3494_v26 = vpack.c.bf16 %v805_v24, %v803_v39 }
 0x19c   : > { %v1293_v37 = vsel %vm664_vm8, %v3237_v63, %v1277_v3  ;;  %v3499_v7 = vpack.c.bf16 %v806_v30, %v804_v55  ;;  %v1343_v61 = vadd.f32 %v3181_v62, %v1295_v58  ;;  %v1356_v62 = vsel %vm496_vm3, %v3404_v34, 0.0  ;;  %v2684_v34 = vld [vmem:[%s4296_s4 + $0x24] ss:$16 sps:$4 sm:$0xff]  }
 0x19d   : > { %833 = vrot.lane.b32.xlu1 %v3365_v8, %s2866_s24  ;;  %v1341_v45 = vadd.f32 %v3179_v60, %v1293_v37  ;;  %v3521_v63 = vpack.c.bf16 %v1358_v28, %v1356_v62  ;;  %v1366_v47 = vsel %vm496_vm3, %v3410_v18, 0.0  ;;  %v1364_v11 = vsel %vm496_vm3, %v3428_v10, 0.0  ;;  %v2680_v18 = vld [vmem:[%s4295_s3 + $0x60] ss:$16 sps:$4 sm:$0xff]  }
 0x19e   : > { %856 = vrot.lane.b32.xlu0 %v3362_v38, %s2867_s25  ;;  %v1359_v13 = vsel %vm505_vm4, %v1343_v61, 0.0  ;;  %v3539_v22 = vpack.c.bf16 %v1366_v47, %v1364_v11  ;;  %v1287_v2 = vmul.f32 %v3157_v48, %v3393_v33  ;;  %v1285_v41 = vmul.f32 %v3165_v53, %v3401_v40  ;;  %v2671_v48 = vld [vmem:[%s4295_s3 + $0x4] ss:$16 sps:$4 sm:$0xff]  }
 0x19f   : > { %v1357_v60 = vsel %vm505_vm4, %v1341_v45, 0.0  ;;  %1142 = vmatprep.mubr.bf16.mxu1 %v2671_v48  ;;  %vm864_vm6 = vcmask 1014784   ;;  %vm1097_vm8 = vcmask 523264   ;;  %vm939_vm3 = vcmask 965632  }
 0x1a0   : > { %v3523_v52 = vpack.c.bf16 %v1359_v13, %v1357_v60  ;;  %v1303_v3 = vsel %vm674_vm1, %v3393_v33, %v1287_v2  ;;  %v1301_v24 = vsel %vm672_vm2, %v3401_v40, %v1285_v41  ;;  %vm914_vm9 = vcmask 982016  }
 0x1a1   : > { %858 = vrot.lane.b32.xlu1 %v3365_v8, %s2867_s25  ;;  %v1351_v53 = vadd.f32 %v3173_v57, %v1303_v3  ;;  %v1349_v33 = vadd.f32 %v3161_v50, %v1301_v24  ;;  %v2869_v50 = vmov 4   ;;  %vm964_vm10 = vcmask 949248  }
 0x1a2   : > { %1440 = vrot.lane.b32.xlu0 %v3460_v17, %s2865_s22  ;;  %2653 = vset.pattern.permute.xlu1 %v2869_v50 }
 0x1a3   : > { %v1367_v30 = vsel %vm505_vm4, %v1351_v53, 0.0  ;;  %v1365_v57 = vsel %vm505_vm4, %v1349_v33, 0.0  ;;  %2652 = vset.pattern.permute.xlu0 %v2869_v50  ;;  %vm889_vm4 = vcmask 998400  }
 0x1a4   : > { %v1375_v40 = vpack.c.bf16 %v1367_v30, %v1365_v57 }
 0x1a5   : > { %1442 = vrot.lane.b32.xlu1 %v3462_v32, %s2865_s22 }
 0x1a6   : > { %1392 = vrot.lane.b32.xlu0 %v3460_v17, %s2866_s24 }
 0x1a9   : > { %1394 = vrot.lane.b32.xlu1 %v3462_v32, %s2866_s24 }
 0x1aa   : > { %885 = vrot.lane.b32.xlu0 %v3494_v26, %s2865_s22 }
 0x1ad   : > { %887 = vrot.lane.b32.xlu1 %v3499_v7, %s2865_s22 }
 0x1ae   : > { %835 = vrot.lane.b32.xlu0 %v3494_v26, %s2866_s24 }
 0x1b1   : > { %837 = vrot.lane.b32.xlu1 %v3499_v7, %s2866_s24 }
 0x1b2   : > { %1436 = vrot.lane.b32.xlu0 %v3521_v63, %s2865_s22 }
 0x1b5   : > { %1438 = vrot.lane.b32.xlu1 %v3523_v52, %s2865_s22 }
 0x1b6   : > { %860 = vrot.lane.b32.xlu0 %v3494_v26, %s2867_s25 }
 0x1b9   : > { %1390 = vrot.lane.b32.xlu1 %v3523_v52, %s2866_s24 }
 0x1ba   : > { %1444 = vrot.lane.b32.xlu0 %v3539_v22, %s2865_s22 }
 0x1bd   : > { %862 = vrot.lane.b32.xlu1 %v3499_v7, %s2867_s25 }
 0x1be   : > { %1396 = vrot.lane.b32.xlu0 %v3539_v22, %s2866_s24 }
 0x1c1   : > { %1434 = vrot.lane.b32.xlu1 %v3244_v4, %s2865_s22 }
 0x1c2   : > { %1388 = vrot.lane.b32.xlu0 %v3521_v63, %s2866_s24 }
 0x1c5   : > { %1386 = vrot.lane.b32.xlu1 %v3244_v4, %s2866_s24 }
 0x1c6   : > { %1432 = vrot.lane.b32.xlu0 %v3230_v25, %s2865_s22 }
 0x1c9   : > { %1418 = vrot.lane.b32.xlu1 %v3462_v32, %s2867_s25 }
 0x1ca   : > { %1384 = vrot.lane.b32.xlu0 %v3230_v25, %s2866_s24 }
 0x1cd   : > { %1446 = vrot.lane.b32.xlu1 %v1375_v40, %s2865_s22  ;;  %s2874_s22 = smov [#allocation2]  }
 0x1ce   : > { %1420 = vrot.lane.b32.xlu0 %v3539_v22, %s2867_s25 }
 0x1d1   : > { %1398 = vrot.lane.b32.xlu1 %v1375_v40, %s2866_s24  ;;  %s2785_s24 = sshll.u32 %s2874_s22, 4  ;;  %s2786_s24 = int_to_ptr.vmem [resolvable:$false] %s2785_s24 }
 0x1d2   : > { %1416 = vrot.lane.b32.xlu0 %v3460_v17, %s2867_s25 }
 0x1d5   : > { %1414 = vrot.lane.b32.xlu1 %v3523_v52, %s2867_s25 }
 0x1d6   : > { %1412 = vrot.lane.b32.xlu0 %v3521_v63, %s2867_s25 }
 0x1d9   : > { %1410 = vrot.lane.b32.xlu1 %v3244_v4, %s2867_s25 }
 0x1da   : > { %1408 = vrot.lane.b32.xlu0 %v3230_v25, %s2867_s25 }
 0x1dd   : > { %1422 = vrot.lane.b32.xlu1 %v1375_v40, %s2867_s25  ;;  %s343_s25 = sand.u32 1, %s2841_s28  }
 0x1de   : > { %1492 = vrot.lane.b32.xlu0 %v3539_v22, %s2868_s26  ;;  %s2334_s19 = sshll.u32 %s343_s25, 7 }
 0x1df   : > { %s4203_s20 = scalar_lea.vmem [#allocation2], %s2334_s19  ;;  %s2787_s19 = scalar_lea.vmem %s2786_s24, 4096 }
 0x1e1   : > { %1490 = vrot.lane.b32.xlu1 %v3462_v32, %s2868_s26 }
 0x1e2   : > { %1488 = vrot.lane.b32.xlu0 %v3460_v17, %s2868_s26 }
 0x1e5   : > { %1486 = vrot.lane.b32.xlu1 %v3523_v52, %s2868_s26 }
 0x1e6   : > { %1484 = vrot.lane.b32.xlu0 %v3521_v63, %s2868_s26 }
 0x1e9   : > { %1482 = vrot.lane.b32.xlu1 %v3244_v4, %s2868_s26 }
 0x1ea   : > { %1480 = vrot.lane.b32.xlu0 %v3230_v25, %s2868_s26 }
 0x1ed   : > { %1466 = vrot.lane.b32.xlu1 %v3462_v32, %s2870_s11 }
 0x1ee   : > { %1468 = vrot.lane.b32.xlu0 %v3539_v22, %s2870_s11 }
 0x1f0   : > { %v3612_v5 = vpop.permute.xlu0 %873 }
 0x1f1   : > { %1494 = vrot.lane.b32.xlu1 %v1375_v40, %s2868_s26 }
 0x1f2   : > { %1464 = vrot.lane.b32.xlu0 %v3460_v17, %s2870_s11 }
 0x1f3   : > { %v3614_v58 = vpop.permute.xlu1 %875 }
 0x1f4   : > { %v3620_v39 = vpop.permute.xlu0 %823 }
 0x1f5   : > { %1462 = vrot.lane.b32.xlu1 %v3523_v52, %s2870_s11 }
 0x1f6   : > { %1460 = vrot.lane.b32.xlu0 %v3521_v63, %s2870_s11 }
 0x1f7   : > { %v3622_v55 = vpop.permute.xlu1 %825 }
 0x1f8   : > { %v3628_v37 = vpop.permute.xlu0 %848 }
 0x1f9   : > { %1458 = vrot.lane.b32.xlu1 %v3244_v4, %s2870_s11 }
 0x1fa   : > { %1456 = vrot.lane.b32.xlu0 %v3230_v25, %s2870_s11 }
 0x1fb   : > { %v3630_v61 = vpop.permute.xlu1 %850 }
 0x1fc   : > { %v878_v45 = vpop.permute.xlu0 %877 }
 0x1fd   : > { %933 = vrot.lane.b32.xlu1 %v3365_v8, %s2868_s26 }
 0x1fe   : > { %935 = vrot.lane.b32.xlu0 %v3494_v26, %s2868_s26 }
 0x1ff   : > { %v880_v28 = vpop.permute.xlu1 %879 }
 0x200   : > { %v828_v13 = vpop.permute.xlu0 %827 }
 0x201   : > { %1470 = vrot.lane.b32.xlu1 %v1375_v40, %s2870_s11 }
 0x202   : > { %1516 = vrot.lane.b32.xlu0 %v3539_v22, %s2871_s12 }
 0x203   : > { %v830_v62 = vpop.permute.xlu1 %829 }
 0x204   : > { %v3643_v60 = vpop.permute.xlu0 %852 }
 0x205   : > { %1514 = vrot.lane.b32.xlu1 %v3462_v32, %s2871_s12 }
 0x206   : > { %931 = vrot.lane.b32.xlu0 %v3362_v38, %s2868_s26 }
 0x207   : > { %v3645_v47 = vpop.permute.xlu1 %854 }
 0x208   : > { %v882_v11 = vpop.permute.xlu0 %881 }
 0x209   : > { %929 = vrot.lane.b32.xlu1 %v3305_v36, %s2868_s26 }
 0x20a   : > { %1512 = vrot.lane.b32.xlu0 %v3460_v17, %s2871_s12 }
 0x20b   : > { %v884_v2 = vpop.permute.xlu1 %883 }
 0x20c   : > { %v832_v22 = vpop.permute.xlu0 %831 }
 0x20d   : > { %937 = vrot.lane.b32.xlu1 %v3499_v7, %s2868_s26 }
 0x20e   : > { %927 = vrot.lane.b32.xlu0 %v3301_v46, %s2868_s26 }
 0x20f   : > { %v834_v32 = vpop.permute.xlu1 %833 }
 0x210   : > { %v3658_v41 = vpop.permute.xlu0 %856 }
 0x211   : > { %1518 = vrot.lane.b32.xlu1 %v1375_v40, %s2871_s12 }
 0x212   : > { %1508 = vrot.lane.b32.xlu0 %v3521_v63, %s2871_s12 }
 0x213   : > { %v859_v3 = vpop.permute.xlu1 %858 }
 0x214   : > { %v3664_v17 = vpop.permute.xlu0 %1440  ;;  %v867_v1 = vsel %vm864_vm6, %v3658_v41, %v859_v3  ;;  %v3829_v3 = vld [vmem:[%s4298_s6 + $0x10] sm:$0xff] }
 0x215   : > { %1510 = vrot.lane.b32.xlu1 %v3523_v52, %s2871_s12 }
 0x216   : > { %923 = vrot.lane.b32.xlu0 %v3222_v19, %s2868_s26 }
 0x217   : > { %v3666_v48 = vpop.permute.xlu1 %1442 }
 0x218   : > { %v3672_v24 = vpop.permute.xlu0 %1392  ;;  %v1450_v44 = vsel %vm889_vm4, %v3664_v17, %v3666_v48 }
 0x219   : > { %925 = vrot.lane.b32.xlu1 %v3228_v23, %s2868_s26  ;;  %s2438_s26 = sshll.u32 %s2849_s30, 11  ;;  %s4247_s30 = scalar_lea.sflag [#allocation3], %s343_s25 }
 0x21a   : > { %1504 = vrot.lane.b32.xlu0 %v3230_v25, %s2871_s12  ;;  %s4238_s16 = scalar_lea.hbm %s4300_s8, %s2438_s26 }
 0x21b   : > { %v3674_v53 = vpop.permute.xlu1 %1394 }
 0x21c   : > { %v886_v63 = vpop.permute.xlu0 %885 }
 0x21d   : > { %1506 = vrot.lane.b32.xlu1 %v3244_v4, %s2871_s12  ;;  %v892_v4 = vsel %vm889_vm4, %v882_v11, %v884_v2  ;;  %v841_v11 = vsel %vm839_vm5, %v828_v13, %v830_v62  ;;  %v890_v2 = vsel %vm889_vm4, %v3612_v5, %v3614_v58  ;;  %v2707_v5 = vld [vmem:[%s4295_s3 + $0xc] ss:$16 sps:$4 sm:$0xff]   ;;  %v2674_v62 = vld [vmem:[%s4295_s3 + $0x20] ss:$16 sps:$4 sm:$0xff]  }
 0x21e   : > { %910 = vrot.lane.b32.xlu0 %v3494_v26, %s2870_s11  ;;  %2371 = vmatprep.mubr.msk.bf16.mxu0 %vm1097_vm8, %v2707_v5 }
 0x21f   : > { %v888_v52 = vpop.permute.xlu1 %887 }
 0x220   : > { %v893_v33 = vsel %vm889_vm4, %v886_v63, %v888_v52  ;;  %v836_v30 = vpop.permute.xlu0 %835  ;;  %v842_v63 = vsel %vm839_vm5, %v832_v22, %v834_v32  ;;  %v891_v52 = vsel %vm889_vm4, %v878_v45, %v880_v28  ;;  %v840_v28 = vsel %vm839_vm5, %v3620_v39, %v3622_v55  ;;  %v2675_v32 = vld [vmem:[%s4295_s3 + $0x44] ss:$16 sps:$4 sm:$0xff]  }
 0x221   : > { %912 = vrot.lane.b32.xlu1 %v3499_v7, %s2870_s11  ;;  %2439 = vmatprep.subr.bf16.mxu1 %v893_v33 }
 0x222   : > { %906 = vrot.lane.b32.xlu0 %v3362_v38, %s2870_s11 }
 0x223   : > { %v838_v57 = vpop.permute.xlu1 %837 }
 0x224   : > { %v843_v25 = vsel %vm839_vm5, %v836_v30, %v838_v57  ;;  %v3691_v40 = vpop.permute.xlu0 %1436 }
 0x225   : > { %908 = vrot.lane.b32.xlu1 %v3365_v8, %s2870_s11  ;;  %2440 = vmatpush3.bf16.msra.mxu1 %v843_v25  ;;  %v3845_v25 = vld [vmem:[%s4298_s6] sm:$0xff] }
 0x226   : > { %2441 = vmatprep.subr.bf16.mxu1 %v892_v4  ;;  %902 = vrot.lane.b32.xlu0 %v3301_v46, %s2870_s11 }
 0x227   : > { %v3693_v50 = vpop.permute.xlu1 %1438 }
 0x228   : > { %v861_v33 = vpop.permute.xlu0 %860 }
 0x229   : > { %904 = vrot.lane.b32.xlu1 %v3305_v36, %s2870_s11  ;;  %2442 = vmatpush3.bf16.msra.mxu1 %v842_v63  ;;  %v2677_v63 = vld [vmem:[%s4295_s3 + $0x40] ss:$16 sps:$4 sm:$0xff]  }
 0x22a   : > { %2443 = vmatprep.subr.bf16.mxu1 %v891_v52  ;;  %898 = vrot.lane.b32.xlu0 %v3222_v19, %s2870_s11  ;;  %v2872_v52 = vmov 7  }
 0x22b   : > { %v3701_v30 = vpop.permute.xlu1 %1390 }
 0x22c   : > { %v1445_v22 = vpop.permute.xlu0 %1444 }
 0x22d   : > { %900 = vrot.lane.b32.xlu1 %v3228_v23, %s2870_s11  ;;  %2444 = vmatpush3.bf16.msra.mxu1 %v841_v11  ;;  %v2873_v11 = vmov 2   ;;  %s2230_s11 = sshll.u32 %s4203_s20, 4  ;;  %s4240_s11 = int_to_ptr.vmem [resolvable:$true] %s2230_s11 }
 0x22e   : > { %2445 = vmatprep.subr.bf16.mxu1 %v890_v2  ;;  %960 = vrot.lane.b32.xlu0 %v3494_v26, %s2871_s12  ;;  %v2686_v26 = vld [vmem:[%s4296_s4 + $0x20] ss:$16 sps:$4 sm:$0xff]   ;;  %s2781_s21 = scalar_lea.vmem %s4240_s11, 2048  ;;  %p2788_p1 = scmp.lt.s32.totalorder %s4240_s11, %s2786_s24 }
 0x22f   : > { %v863_v45 = vpop.permute.xlu1 %862  ;;  %p2782_p12 = scmp.ne.s32.totalorder %s4240_s11, %s2781_s21  ;;  %p2789_p2 = scmp.lt.s32.totalorder %s2787_s19, %s2781_s21 }
 0x230   : > { %v868_v13 = vsel %vm864_vm6, %v861_v33, %v863_v45  ;;  %v1397_v58 = vpop.permute.xlu0 %1396  ;;  %v2678_v33 = vld [vmem:[%s4295_s3 + $0x64] ss:$16 sps:$4 sm:$0xff]  }
 0x231   : > { %962 = vrot.lane.b32.xlu1 %v3499_v7, %s2871_s12  ;;  %2446 = vmatpush3.bf16.msra.mxu1 %v840_v28  ;;  %p2783_p13 = pnand %p2782_p12, %p2962_p4  ;;  %p2790_p3 = por %p2789_p2, %p2788_p1 }
 0x232   : > { %2447 = vmatprep.subr.bf16.mxu1 %v868_v13  ;;  %956 = vrot.lane.b32.xlu0 %v3362_v38, %s2871_s12  ;;  %v866_v38 = vsel %vm864_vm6, %v3643_v60, %v3645_v47  ;;  %v3817_v60 = vld [vmem:[%s4298_s6 + $0x18] sm:$0xff]  ;;  %v1449_v47 = vsel %vm889_vm4, %v3691_v40, %v3693_v50 }
 0x233   : > { %v3729_v39 = vpop.permute.xlu1 %1434  ;;  %p2784_p0 = pneg %p2783_p13 }
 0x234   : > { %v1389_v7 = vpop.permute.xlu0 %1388 }
 0x235   : > { %958 = vrot.lane.b32.xlu1 %v3365_v8, %s2871_s12  ;;  %2448 = vmatpush3.bf16.msk.msra.mxu1 %vm3725_vm7, %v2360_v56  ;;  %v1401_v48 = vsel %vm839_vm5, %v1389_v7, %v3701_v30  ;;  %v2687_v7 = vld [vmem:[%s4296_s4 + $0x44] ss:$16 sps:$4 sm:$0xff]   ;;  %p2791_p5 = pnand %p2790_p3, %p2784_p0 }
 0x236   : > { %2449 = vmatprep.subr.bf16.mxu1 %v867_v1  ;;  %952 = vrot.lane.b32.xlu0 %v3301_v46, %s2871_s12  ;;  %v865_v46 = vsel %vm864_vm6, %v3628_v37, %v3630_v61  ;;  %v1402_v61 = vsel %vm839_vm5, %v3672_v24, %v3674_v53  ;;  %v3837_v24 = vld [vmem:[%s4298_s6 + $0x8] sm:$0xff] }
 0x237   : > { %v3743_v55 = vpop.permute.xlu1 %1386 }
 0x238   : > { %v1433_v8 = vpop.permute.xlu0 %1432 }
 0x239   : > { %954 = vrot.lane.b32.xlu1 %v3305_v36, %s2871_s12  ;;  %2450 = vmatpush3.bf16.msk.msra.mxu1 %vm3725_vm7, %v2363_v59  ;;  %v1448_v53 = vsel %vm889_vm4, %v1433_v8, %v3729_v39 }
 0x23a   : > { %2451 = vmatprep.subr.bf16.mxu1 %v866_v38  ;;  %948 = vrot.lane.b32.xlu0 %v3222_v19, %s2871_s12  ;;  %v2669_v19 = vld [vmem:[%s4295_s3] ss:$16 sps:$4 sm:$0xff]  }
 0x23b   : > { %v3757_v43 = vpop.permute.xlu1 %1418 }
 0x23c   : > { %v1385_v36 = vpop.permute.xlu0 %1384 }
 0x23d   : > { %950 = vrot.lane.b32.xlu1 %v3228_v23, %s2871_s12  ;;  %2452 = vmatpush3.bf16.msk.msra.mxu1 %vm3725_vm7, %v2366_v54  ;;  %v2757_v23 = vld [vmem:[%s4298_s6 + $0x30] sm:$0xff]  ;;  %v1400_v40 = vsel %vm839_vm5, %v1385_v36, %v3743_v55 }
 0x23e   : > { %2453 = vmatprep.subr.bf16.mxu1 %v865_v46  ;;  %1569 = vperm.xlu0 %2652, %v2757_v23  }
 0x23f   : > { %v1447_v49 = vpop.permute.xlu1 %1446 }
 0x240   : > { %v1451_v51 = vsel %vm889_vm4, %v1445_v22, %v1447_v49  ;;  %v1421_v16 = vpop.permute.xlu0 %1420  ;;  %v2689_v49 = vld [vmem:[%s4296_s4 + $0x40] ss:$16 sps:$4 sm:$0xff]  }
 0x241   : > { %2454 = vmatpush3.bf16.msk.msra.mxu1 %vm3725_vm7, %v2369_v29  ;;  %1573 = vperm.xlu1 %2653, %v3789_v12   ;;  %v3805_v29 = vld [vmem:[%s4298_s6 + $0x20] sm:$0xff] }
 0x242   : > { %2479 = vmatprep.subr.bf16.mxu1 %v1451_v51  ;;  %1565 = vperm.xlu0 %2652, %v3796_v21   ;;  %v2690_v51 = vld [vmem:[%s4296_s4 + $0x64] ss:$16 sps:$4 sm:$0xff]  }
 0x243   : > { %v1399_v56 = vpop.permute.xlu1 %1398 }
 0x244   : > { %v1403_v59 = vsel %vm839_vm5, %v1397_v58, %v1399_v56  ;;  %1143 = vmatmul.mubr.bf16.vlgmr.msra.gmra.mxu1 %v2669_v19  ;;  %v1417_v54 = vpop.permute.xlu0 %1416  ;;  %v2681_v58 = vld [vmem:[%s4296_s4] ss:$16 sps:$4 sm:$0xff]  }
 0x245   : > { %2480 = vmatpush3.bf16.msra.mxu1 %v1403_v59  ;;  %1150 = vmatprep.mubr.bf16.mxu1 %v2672_v35  ;;  %v1426_v22 = vsel %vm864_vm6, %v1417_v54, %v3757_v43  ;;  %v2692_v59 = vld [vmem:[%s4296_s4 + $0x60] ss:$16 sps:$4 sm:$0xff]  }
 0x246   : > { %2481 = vmatprep.subr.bf16.mxu1 %v1450_v44  ;;  %1561 = vperm.xlu1 %2653, %v3805_v29  }
 0x247   : > { %v1415_v37 = vpop.permute.xlu1 %1414  ;;  %1557 = vperm.xlu0 %2652, %v3817_v60  }
 0x248   : > { %v1413_v41 = vpop.permute.xlu0 %1412 }
 0x249   : > { %2482 = vmatpush3.bf16.msra.mxu1 %v1402_v61  ;;  %v1425_v10 = vsel %vm864_vm6, %v1413_v41, %v1415_v37 }
 0x24a   : > { %2483 = vmatprep.subr.bf16.mxu1 %v1449_v47  ;;  %1553 = vperm.xlu1 %2653, %v3829_v3  }
 0x24b   : > { %v1411_v17 = vpop.permute.xlu1 %1410  ;;  %1549 = vperm.xlu0 %2652, %v3837_v24  }
 0x24c   : > { %1151 = vmatmul.mubr.bf16.gmra.mxu1 %v2674_v62  ;;  %v1409_v57 = vpop.permute.xlu0 %1408 }
 0x24d   : > { %2484 = vmatpush3.bf16.msra.mxu1 %v1401_v48  ;;  %1158 = vmatprep.mubr.bf16.mxu1 %v2675_v32  ;;  %v1424_v6 = vsel %vm864_vm6, %v1409_v57, %v1411_v17 }
 0x24e   : > { %2485 = vmatprep.subr.bf16.mxu1 %v1448_v53  ;;  %1545 = vperm.xlu1 %2653, %v3845_v25  }
 0x24f   : > { %v1423_v4 = vpop.permute.xlu1 %1422  ;;  %2655 = vset.pattern.permute.xlu0 %v2872_v52 }
 0x250   : > { %v1427_v50 = vsel %vm864_vm6, %v1421_v16, %v1423_v4  ;;  %1883 = vperm.xlu0 %2655, %v2757_v23   ;;  %v1493_v30 = vpop.permute.xlu0 %1492 }
 0x251   : > { %2486 = vmatpush3.bf16.msra.mxu1 %v1400_v40 }
 0x252   : > { %2487 = vmatprep.subr.bf16.mxu1 %v1427_v50  ;;  %2654 = vset.pattern.permute.xlu1 %v2873_v11 }
 0x253   : > { %v1491_v2 = vpop.permute.xlu1 %1490  ;;  %1014 = vperm.xlu1 %2654, %v2757_v23  }
 0x254   : > { %1159 = vmatmul.mubr.bf16.gmra.mxu1 %v2677_v63  ;;  %v1489_v45 = vpop.permute.xlu0 %1488  ;;  %2656 = vset.pattern.permute.xlu0 %v2873_v11 }
 0x255   : > { %2488 = vmatpush3.bf16.msk.msra.mxu1 %vm3725_vm7, %v2392_v31  ;;  %1166 = vmatprep.mubr.bf16.mxu1 %v2678_v33  ;;  %v2683_v31 = vld [vmem:[%s4296_s4 + $0x4] ss:$16 sps:$4 sm:$0xff]   ;;  %v2693_v33 = vld [vmem:[%s4296_s4 + $0x8] ss:$16 sps:$4 sm:$0xff]  }
 0x256   : > { %2489 = vmatprep.subr.bf16.mxu1 %v1426_v22  ;;  %1018 = vperm.xlu0 %2656, %v3789_v12  }
 0x257   : > { %v1487_v28 = vpop.permute.xlu1 %1486  ;;  %1006 = vperm.xlu1 %2654, %v3805_v29  }
 0x258   : > { %v1485_v13 = vpop.permute.xlu0 %1484 }
 0x259   : > { %2490 = vmatpush3.bf16.msk.msra.mxu1 %vm3725_vm7, %v2395_v15  ;;  %v1497_v8 = vsel %vm939_vm3, %v1485_v13, %v1487_v28 }
 0x25a   : > { %2491 = vmatprep.subr.bf16.mxu1 %v1425_v10  ;;  %1002 = vperm.xlu0 %2656, %v3817_v60   ;;  %v2698_v10 = vld [vmem:[%s4296_s4 + $0x28] ss:$16 sps:$4 sm:$0xff]  }
 0x25b   : > { %v1483_v5 = vpop.permute.xlu1 %1482  ;;  %1010 = vperm.xlu1 %2654, %v3796_v21  }
 0x25c   : > { %1167 = vmatmul.mubr.bf16.gmra.mxu1 %v2680_v18  ;;  %v1481_v0 = vpop.permute.xlu0 %1480 }
 0x25d   : > { %2492 = vmatpush3.bf16.msk.msra.mxu1 %vm3725_vm7, %v2398_v27  ;;  %1696 = vmatprep.mubr.bf16.mxu1 %v2683_v31  ;;  %v4307_v27 = vmov 0   ;;  %v1496_v36 = vsel %vm939_vm3, %v1481_v0, %v1483_v5  ;;  %v2699_v31 = vld [vmem:[%s4296_s4 + $0x4c] ss:$16 sps:$4 sm:$0xff]  }
 0x25e   : > { %2493 = vmatprep.subr.bf16.mxu1 %v1424_v6  ;;  %990 = vperm.xlu0 %2656, %v3845_v25  }
 0x25f   : > { %v1467_v15 = vpop.permute.xlu1 %1466  ;;  %2657 = vset.pattern.permute.xlu1 %v2872_v52 }
 0x260   : > { %1887 = vperm.xlu1 %2657, %v3789_v12   ;;  %v1469_v9 = vpop.permute.xlu0 %1468 }
 0x261   : > { %2494 = vmatpush3.bf16.msk.msra.mxu1 %vm3725_vm7, %v2401_v42  ;;  %v1498_v42 = vsel %vm939_vm3, %v1489_v45, %v1491_v2 }
 0x262   : > { %1729 = vmatprep.subr.bf16.mxu1 %v4307_v27  ;;  %2661 = vset.pattern.permute.xlu0 %v2872_v52 }
 0x263   : > { %v1495_v39 = vpop.permute.xlu1 %1494  ;;  %1867 = vperm.xlu0 %2661, %v3829_v3  }
 0x264   : > { %v1499_v1 = vsel %vm939_vm3, %v1493_v30, %v1495_v39  ;;  %1697 = vmatmul.mubr.bf16.vlgmr.msra.gmra.mxu1 %v2681_v58  ;;  %2658 = vset.pattern.permute.xlu1 %v2873_v11  ;;  %v1465_v20 = vpop.permute.xlu0 %1464  ;;  %v2696_v30 = vld [vmem:[%s4296_s4 + $0x2c] ss:$16 sps:$4 sm:$0xff]  }
 0x265   : > { %1730 = vmatpush1.bf16.msra.mxu1 %v1499_v1  ;;  %1704 = vmatprep.mubr.bf16.mxu1 %v2684_v34  ;;  %v1474_v56 = vsel %vm914_vm9, %v1465_v20, %v1467_v15  ;;  %v2701_v34 = vld [vmem:[%s4296_s4 + $0x48] ss:$16 sps:$4 sm:$0xff]  }
 0x266   : > { %1731 = vmatprep.subr.bf16.mxu1 %v4307_v27  ;;  %998 = vperm.xlu1 %2658, %v3829_v3  }
 0x267   : > { %v1463_v14 = vpop.permute.xlu1 %1462  ;;  %1863 = vperm.xlu0 %2661, %v3837_v24  }
 0x268   : > { %v1461_v55 = vpop.permute.xlu0 %1460 }
 0x269   : > { %1732 = vmatpush1.bf16.msra.mxu1 %v1498_v42 }
 0x26a   : > { %1733 = vmatprep.subr.bf16.mxu1 %v4307_v27  ;;  %2659 = vset.pattern.permute.xlu1 %v2872_v52 }
 0x26b   : > { %v1459_v38 = vpop.permute.xlu1 %1458  ;;  %1875 = vperm.xlu1 %2659, %v3805_v29   ;;  %2664 = vset.pattern.permute.xlu0 %v4307_v27  ;;  %v1473_v29 = vsel %vm914_vm9, %v1461_v55, %v1463_v14 }
 0x26c   : > { %1705 = vmatmul.mubr.bf16.gmra.mxu1 %v2686_v26  ;;  %v1457_v43 = vpop.permute.xlu0 %1456 }
 0x26d   : > { %1734 = vmatpush1.bf16.msra.mxu1 %v1497_v8  ;;  %1712 = vmatprep.mubr.bf16.mxu1 %v2687_v7  ;;  %v1472_v62 = vsel %vm914_vm9, %v1457_v43, %v1459_v38  ;;  %v2704_v7 = vld [vmem:[%s4296_s4 + $0x68] ss:$16 sps:$4 sm:$0xff]  }
 0x26e   : > { %1735 = vmatprep.subr.bf16.mxu1 %v4307_v27 }
 0x26f   : > { %v934_v46 = vpop.permute.xlu1 %933  ;;  %1879 = vperm.xlu1 %2659, %v3796_v21   ;;  %v2695_v21 = vld [vmem:[%s4296_s4 + $0xc] ss:$16 sps:$4 sm:$0xff]  }
 0x270   : > { %v936_v19 = vpop.permute.xlu0 %935 }
 0x271   : > { %1736 = vmatpush1.bf16.msra.mxu1 %v1496_v36 }
 0x272   : > { %1737 = vmatprep.subr.bf16.mxu1 %v4307_v27 }
 0x273   : > { %v1471_v23 = vpop.permute.xlu1 %1470  ;;  %2660 = vset.pattern.permute.xlu1 %v2873_v11 }
 0x274   : > { %v1475_v35 = vsel %vm914_vm9, %v1469_v9, %v1471_v23  ;;  %1713 = vmatmul.mubr.bf16.gmra.mxu1 %v2689_v49  ;;  %994 = vperm.xlu1 %2660, %v3837_v24   ;;  %v1517_v12 = vpop.permute.xlu0 %1516  ;;  %v2702_v9 = vld [vmem:[%s4296_s4 + $0x6c] ss:$16 sps:$4 sm:$0xff]   ;;  %v2705_v49 = vld [vmem:[%s4295_s3 + $0x8] ss:$16 sps:$4 sm:$0xff]  }
 0x275   : > { %1738 = vmatpush1.bf16.msra.mxu1 %v1475_v35  ;;  %1720 = vmatprep.mubr.bf16.mxu1 %v2690_v51  ;;  %v2708_v51 = vld [vmem:[%s4295_s3 + $0x2c] ss:$16 sps:$4 sm:$0xff]   ;;  %v2713_v23 = vld [vmem:[%s4295_s3 + $0x48] ss:$16 sps:$4 sm:$0xff]  }
 0x276   : > { %1739 = vmatprep.subr.bf16.mxu1 %v4307_v27  ;;  %v2714_v35 = vld [vmem:[%s4295_s3 + $0x6c] ss:$16 sps:$4 sm:$0xff]  }
 0x277   : > { %v1515_v16 = vpop.permute.xlu1 %1514 }
 0x278   : > { %2662 = vset.pattern.permute.xlu1 %v2872_v52  ;;  %v932_v44 = vpop.permute.xlu0 %931 }
 0x279   : > { %1740 = vmatpush1.bf16.msra.mxu1 %v1474_v56  ;;  %1871 = vperm.xlu1 %2662, %v3817_v60   ;;  %v942_v41 = vsel %vm939_vm3, %v932_v44, %v934_v46 }
 0x27a   : > { %1741 = vmatprep.subr.bf16.mxu1 %v4307_v27 }
 0x27b   : > { %v930_v54 = vpop.permute.xlu1 %929 }
 0x27c   : > { %1721 = vmatmul.mubr.bf16.gmra.mxu1 %v2692_v59  ;;  %v1513_v37 = vpop.permute.xlu0 %1512 }
 0x27d   : > { %1742 = vmatpush1.bf16.msra.mxu1 %v1473_v29  ;;  %2403 = vmatprep.mubr.msk.bf16.mxu1 %vm1097_vm8, %v2695_v21  ;;  %v1522_v24 = vsel %vm964_vm10, %v1513_v37, %v1515_v16 }
 0x27e   : > { %1743 = vmatprep.subr.bf16.mxu1 %v4307_v27  ;;  %1859 = vperm.xlu1 %2662, %v3845_v25  }
 0x27f   : > { %v938_v61 = vpop.permute.xlu1 %937 }
 0x280   : > { %v943_v60 = vsel %vm939_vm3, %v936_v19, %v938_v61  ;;  %v928_v47 = vpop.permute.xlu0 %927  ;;  %v2711_v19 = vld [vmem:[%s4295_s3 + $0x4c] ss:$16 sps:$4 sm:$0xff]  }
 0x281   : > { %1176 = vmatpush1.bf16.msra.mxu0 %v943_v60  ;;  %1744 = vmatpush1.bf16.msra.mxu1 %v1472_v62  ;;  %v941_v53 = vsel %vm939_vm3, %v928_v47, %v930_v54 }
 0x282   : > { %1177 = vmatprep.subr.bf16.mxu0 %v4307_v27  ;;  %1753 = vmatprep.subr.bf16.mxu1 %v4307_v27 }
 0x283   : > { %v1519_v32 = vpop.permute.xlu1 %1518  ;;  %2663 = vset.pattern.permute.xlu1 %v4307_v27 }
 0x284   : > { %v1523_v3 = vsel %vm964_vm10, %v1517_v12, %v1519_v32  ;;  %v1509_v17 = vpop.permute.xlu0 %1508  ;;  %v2716_v12 = vld [vmem:[%s4295_s3 + $0x68] ss:$16 sps:$4 sm:$0xff]  }
 0x285   : > { %1178 = vmatpush1.bf16.msra.mxu0 %v942_v41  ;;  %1754 = vmatpush2.bf16.msra.mxu1 %v1523_v3 }
 0x286   : > { %1179 = vmatprep.subr.bf16.mxu0 %v4307_v27  ;;  %1755 = vmatprep.subr.bf16.mxu1 %v4307_v27 }
 0x287   : > { %v1511_v48 = vpop.permute.xlu1 %1510 }
 0x288   : > { %v924_v57 = vpop.permute.xlu0 %923  ;;  %v1521_v4 = vsel %vm964_vm10, %v1509_v17, %v1511_v48 }
 0x289   : > { %1180 = vmatpush1.bf16.msra.mxu0 %v941_v53  ;;  %1756 = vmatpush2.bf16.msra.mxu1 %v1522_v24 }
 0x28a   : > { %1181 = vmatprep.subr.bf16.mxu0 %v4307_v27  ;;  %1757 = vmatprep.subr.bf16.mxu1 %v4307_v27 }
 0x28b   : > { %v926_v25 = vpop.permute.xlu1 %925 }
 0x28c   : > { %v940_v40 = vsel %vm939_vm3, %v924_v57, %v926_v25  ;;  %v1505_v50 = vpop.permute.xlu0 %1504 }
 0x28d   : > { %1182 = vmatpush1.bf16.msra.mxu0 %v940_v40  ;;  %1758 = vmatpush2.bf16.msra.mxu1 %v1521_v4 }
 0x28e   : > { %1759 = vmatprep.subr.bf16.mxu1 %v4307_v27  ;;  %1183 = vmatprep.subr.bf16.mxu0 %v4307_v27 }
 0x28f   : > { %v1507_v63 = vpop.permute.xlu1 %1506 }
 0x290   : > { %v1520_v52 = vsel %vm964_vm10, %v1505_v50, %v1507_v63  ;;  %v911_v11 = vpop.permute.xlu0 %910 }
 0x291   : > { %1760 = vmatpush2.bf16.msra.mxu1 %v1520_v52 }
 0x293   : > { %v913_v2 = vpop.permute.xlu1 %912 }
 0x294   : > { %v918_v22 = vsel %vm914_vm9, %v911_v11, %v913_v2  ;;  %1762 = vmatmul.mubr.bf16.vlgmr.msra.gmra.mxu1 %v2693_v33  ;;  %v907_v45 = vpop.permute.xlu0 %906  ;;  %v2717_v11 = vld [vmem:[%s4297_s5] sm:$0xff]  }
 0x295   : > { %1184 = vmatpush1.bf16.msra.mxu0 %v918_v22  ;;  %2404 = vmatprep.mubr.msk.bf16.mxu1 %vm1097_vm8, %v2696_v30 }
 0x296   : > { %1185 = vmatprep.subr.bf16.mxu0 %v4307_v27 }
 0x297   : > { %v909_v28 = vpop.permute.xlu1 %908 }
 0x298   : > { %v917_v18 = vsel %vm914_vm9, %v907_v45, %v909_v28  ;;  %v903_v13 = vpop.permute.xlu0 %902 }
 0x299   : > { %1186 = vmatpush1.bf16.msra.mxu0 %v917_v18 }
 0x29a   : > { %1187 = vmatprep.subr.bf16.mxu0 %v4307_v27 }
 0x29b   : > { %v905_v5 = vpop.permute.xlu1 %904 }
 0x29c   : > { %v916_v6 = vsel %vm914_vm9, %v903_v13, %v905_v5  ;;  %1770 = vmatmul.mubr.bf16.gmra.mxu1 %v2698_v10  ;;  %v899_v0 = vpop.permute.xlu0 %898 }
 0x29d   : > { %1188 = vmatpush1.bf16.msra.mxu0 %v916_v6  ;;  %2405 = vmatprep.mubr.msk.bf16.mxu1 %vm1097_vm8, %v2699_v31 }
 0x29e   : > { %1189 = vmatprep.subr.bf16.mxu0 %v4307_v27 }
 0x29f   : > { %v901_v15 = vpop.permute.xlu1 %900 }
 0x2a0   : > { %v915_v58 = vsel %vm914_vm9, %v899_v0, %v901_v15  ;;  %v961_v39 = vpop.permute.xlu0 %960 }
 0x2a1   : > { %1190 = vmatpush1.bf16.msra.mxu0 %v915_v58 }
 0x2a2   : > { %1199 = vmatprep.subr.bf16.mxu0 %v4307_v27 }
 0x2a3   : > { %v963_v1 = vpop.permute.xlu1 %962 }
 0x2a4   : > { %v968_v20 = vsel %vm964_vm10, %v961_v39, %v963_v1  ;;  %1778 = vmatmul.mubr.bf16.gmra.mxu1 %v2701_v34  ;;  %v957_v14 = vpop.permute.xlu0 %956  ;;  %v1927_v1 = vld [vmem:[%s4299_s7 + $0x8] sm:$0xff] }
 0x2a5   : > { %1200 = vmatpush2.bf16.msra.mxu0 %v968_v20  ;;  %2406 = vmatprep.mubr.msk.bf16.mxu1 %vm1097_vm8, %v2702_v9  ;;  %v1926_v9 = vld [vmem:[%s4299_s7] sm:$0xff]  ;;  %v1928_v20 = vld [vmem:[%s4299_s7 + $0x10] sm:$0xff] }
 0x2a6   : > { %1201 = vmatprep.subr.bf16.mxu0 %v4307_v27  ;;  %1944 = vperm.xlu1 %2663, %v1926_v9  }
 0x2a7   : > { %v959_v42 = vpop.permute.xlu1 %958  ;;  %1949 = vperm.xlu0 %2664, %v1927_v1   ;;  %v1941_v1 = vld [vmem:[%s4299_s7 + $0x78] sm:$0xff] }
 0x2a8   : > { %v967_v26 = vsel %vm964_vm10, %v957_v14, %v959_v42  ;;  %v953_v55 = vpop.permute.xlu0 %952  ;;  %v1930_v42 = vld [vmem:[%s4299_s7 + $0x20] sm:$0xff] }
 0x2a9   : > { %1202 = vmatpush2.bf16.msra.mxu0 %v967_v26 }
 0x2aa   : > { %1203 = vmatprep.subr.bf16.mxu0 %v4307_v27  ;;  %1954 = vperm.xlu1 %2663, %v1928_v20  }
 0x2ab   : > { %v955_v38 = vpop.permute.xlu1 %954  ;;  %1964 = vperm.xlu0 %2664, %v1930_v42  }
 0x2ac   : > { %v966_v8 = vsel %vm964_vm10, %v953_v55, %v955_v38  ;;  %1786 = vmatmul.mubr.bf16.gmra.mxu1 %v2704_v7  ;;  %v949_v43 = vpop.permute.xlu0 %948  ;;  %v1929_v7 = vld [vmem:[%s4299_s7 + $0x18] sm:$0xff] }
 0x2ad   : > { %1204 = vmatpush2.bf16.msra.mxu0 %v966_v8  ;;  %v1932_v8 = vld [vmem:[%s4299_s7 + $0x30] sm:$0xff] }
 0x2ae   : > { %1205 = vmatprep.subr.bf16.mxu0 %v4307_v27  ;;  %v2710_v27 = vld [vmem:[%s4295_s3 + $0x28] ss:$16 sps:$4 sm:$0xff]   ;;  %1959 = vperm.xlu1 %2663, %v1929_v7  }
 0x2af   : > { %v951_v46 = vpop.permute.xlu1 %950  ;;  %1974 = vperm.xlu0 %2664, %v1932_v8  }
 0x2b0   : > { %v965_v36 = vsel %vm964_vm10, %v949_v43, %v951_v46  ;;  %v1931_v43 = vld [vmem:[%s4299_s7 + $0x28] sm:$0xff] }
 0x2b1   : > { %1206 = vmatpush2.bf16.msra.mxu0 %v965_v36  ;;  %v1934_v36 = vld [vmem:[%s4299_s7 + $0x40] sm:$0xff] }
 0x2b2   : > { %1969 = vperm.xlu1 %2663, %v1931_v43  }
 0x2b3   : > { %1984 = vperm.xlu0 %2664, %v1934_v36  }
 0x2b4   : > { %1208 = vmatmul.mubr.bf16.vlgmr.msra.gmra.mxu0 %v2705_v49 }
 0x2b5   : > { %2372 = vmatprep.mubr.msk.bf16.mxu0 %vm1097_vm8, %v2708_v51 }
 0x2b9   : > { %v4064_v34 = vpop.permute.xlu0 %1569 }
 0x2bc   : > { %1216 = vmatmul.mubr.bf16.gmra.mxu0 %v2710_v27  ;;  %v4052_v22 = vpop.permute.xlu1 %1573  ;;  %v1933_v27 = vld [vmem:[%s4299_s7 + $0x38] sm:$0xff] }
 0x2bd   : > { %2373 = vmatprep.mubr.msk.bf16.mxu0 %vm1097_vm8, %v2711_v19  ;;  %v4082_v26 = vpop.permute.xlu0 %1565  ;;  %1979 = vperm.xlu1 %2663, %v1933_v27  }
 0x2c1   : > { %v4054_v10 = vpop.permute.xlu1 %1561 }
 0x2c2   : > { %v1558_v49 = vpop.permute.xlu0 %1557 }
 0x2c4   : > { %1224 = vmatmul.mubr.bf16.gmra.mxu0 %v2713_v23  ;;  %v1936_v23 = vld [vmem:[%s4299_s7 + $0x50] sm:$0xff] }
 0x2c5   : > { %2374 = vmatprep.mubr.msk.bf16.mxu0 %vm1097_vm8, %v2714_v35  ;;  %v1554_v5 = vpop.permute.xlu1 %1553  ;;  %1994 = vperm.xlu0 %2664, %v1936_v23  }
 0x2c9   : > { %v1546_v0 = vpop.permute.xlu1 %1545 }
 0x2cc   : > { %1232 = vmatmul.mubr.bf16.gmra.mxu0 %v2716_v12 }
 0x2cd   : > { %2539 = vmatprep.mubr.msk.bf16.mxu0 %vm1097_vm8, %v2717_v11 }
 0x2ce   : > { %v4069_v39 = vpop.permute.xlu1 %1014 }
 0x2d2   : > { %v4087_v55 = vpop.permute.xlu1 %1006 }
 0x2d6   : > { %v4102_v51 = vpop.permute.xlu1 %1010 }
 0x304   : > { %v2455_v16 = vpop.f32.mrf.mxu1 }
 0x306   : > { %v2456_v56 = vpop.f32.mrf.mxu1 }
 0x307   : > { %v4032_v59 = vadd.f32 %v2456_v56, %v2455_v16  ;;  %v1550_v56 = vpop.permute.xlu0 %1549 }
 0x308   : > { %v2458_v21 = vpop.f32.mrf.mxu1 }
 0x30a   : > { %v2459_v44 = vpop.f32.mrf.mxu1 }
 0x30b   : > { %v4034_v54 = vadd.f32 %v2459_v44, %v2458_v21  ;;  %v1935_v44 = vld [vmem:[%s4299_s7 + $0x48] sm:$0xff] }
 0x30c   : > { %v2461_v29 = vpop.f32.mrf.mxu1  ;;  %1989 = vperm.xlu1 %2663, %v1935_v44  }
 0x30e   : > { %v2462_v37 = vpop.f32.mrf.mxu1 }
 0x30f   : > { %v4036_v61 = vadd.f32 %v2462_v37, %v2461_v29  ;;  %v4115_v29 = vpop.permute.xlu1 %1887 }
 0x310   : > { %v2464_v62 = vpop.f32.mrf.mxu1 }
 0x312   : > { %v2465_v60 = vpop.f32.mrf.mxu1 }
 0x313   : > { %v4038_v47 = vadd.f32 %v2465_v60, %v2464_v62  ;;  %v1938_v62 = vld [vmem:[%s4299_s7 + $0x60] sm:$0xff] }
 0x314   : > { %v2467_v32 = vpop.f32.mrf.mxu1  ;;  %2004 = vperm.xlu0 %2664, %v1938_v62  }
 0x316   : > { %v2468_v41 = vpop.f32.mrf.mxu1 }
 0x317   : > { %v4040_v3 = vadd.f32 %v2468_v41, %v2467_v32 }
 0x318   : > { %v2470_v17 = vpop.f32.mrf.mxu1 }
 0x31a   : > { %v2471_v48 = vpop.f32.mrf.mxu1 }
 0x31b   : > { %v4042_v24 = vadd.f32 %v2471_v48, %v2470_v17 }
 0x31c   : > { %v2473_v53 = vpop.f32.mrf.mxu1 }
 0x31e   : > { %v2474_v57 = vpop.f32.mrf.mxu1 }
 0x31f   : > { %v4044_v25 = vadd.f32 %v2474_v57, %v2473_v53  ;;  %v1937_v53 = vld [vmem:[%s4299_s7 + $0x58] sm:$0xff] }
 0x320   : > { %v2476_v4 = vpop.f32.mrf.mxu1  ;;  %1999 = vperm.xlu1 %2663, %v1937_v53  }
 0x322   : > { %v2477_v40 = vpop.f32.mrf.mxu1 }
 0x323   : > { %v4046_v50 = vadd.f32 %v2477_v40, %v2476_v4  ;;  %v1940_v4 = vld [vmem:[%s4299_s7 + $0x70] sm:$0xff] }
 0x324   : > { %v2495_v63 = vpop.f32.mrf.mxu1  ;;  %2014 = vperm.xlu0 %2664, %v1940_v4  }
 0x326   : > { %v2496_v52 = vpop.f32.mrf.mxu1 }
 0x327   : > { %v2497_v33 = vadd.f32 %v2496_v52, %v2495_v63 }
 0x328   : > { %v2498_v30 = vpop.f32.mrf.mxu1 }
 0x329   : > { %v1699_v12 = vadd.f32 %v2497_v33, %v1546_v0  ;;  %v4126_v33 = vpop.permute.xlu1 %998 }
 0x32a   : > { %v2499_v2 = vpop.f32.mrf.mxu1 }
 0x32b   : > { %v2500_v35 = vadd.f32 %v2499_v2, %v2498_v30  ;;  %v1939_v2 = vld [vmem:[%s4299_s7 + $0x68] sm:$0xff] }
 0x32c   : > { %v2501_v45 = vpop.f32.mrf.mxu1  ;;  %2009 = vperm.xlu1 %2663, %v1939_v2  }
 0x32d   : > { %v1702_v41 = vadd.f32 %v2500_v35, %v1550_v56  ;;  %v4138_v20 = vpop.permute.xlu1 %1875 }
 0x32e   : > { %v2502_v28 = vpop.f32.mrf.mxu1 }
 0x32f   : > { %v2503_v60 = vadd.f32 %v2502_v28, %v2501_v45  ;;  %v4131_v45 = vpop.permute.xlu0 %1883 }
 0x330   : > { %v2504_v18 = vpop.f32.mrf.mxu1  ;;  %2019 = vperm.xlu1 %2663, %v1941_v1  }
 0x331   : > { %v1707_v52 = vadd.f32 %v2503_v60, %v1554_v5  ;;  %v4148_v56 = vpop.permute.xlu1 %1879 }
 0x332   : > { %v2505_v31 = vpop.f32.mrf.mxu1 }
 0x333   : > { %v2506_v40 = vadd.f32 %v2505_v31, %v2504_v18 }
 0x334   : > { %v4056_v13 = vpop.f32.mrf.mxu1 }
 0x335   : > { %v1710_v31 = vadd.f32 %v2506_v40, %v1558_v49 }
 0x336   : > { %v4058_v6 = vpop.f32.mrf.mxu1 }
 0x337   : > { %v2509_v0 = vadd.f32 %v4058_v6, %v4056_v13  ;;  %v4143_v13 = vpop.permute.xlu0 %1018 }
 0x338   : > { %v4060_v15 = vpop.f32.mrf.mxu1 }
 0x339   : > { %v1715_v43 = vadd.f32 %v2509_v0, %v4054_v10 }
 0x33a   : > { %v4062_v58 = vpop.f32.mrf.mxu1 }
 0x33b   : > { %v2512_v7 = vadd.f32 %v4062_v58, %v4060_v15 }
 0x33c   : > { %v4077_v14 = vpop.f32.mrf.mxu1 }
 0x33e   : > { %v4089_v38 = vpop.f32.mrf.mxu1 }
 0x33f   : > { %v2515_v23 = vadd.f32 %v4089_v38, %v4077_v14 }
 0x340   : > { %v4097_v46 = vpop.f32.mrf.mxu1 }
 0x341   : > { %v1723_v14 = vadd.f32 %v2515_v23, %v4064_v34  ;;  %v1153_v23 = vadd.f32 %v4036_v61, %v4126_v33 }
 0x342   : > { %v4107_v19 = vpop.f32.mrf.mxu1 }
 0x354   : > { %v1763_v16 = vpop.f32.mrf.mxu1 }
 0x355   : > { %v1764_v21 = vadd.f32 %v1763_v16, %v1699_v12  ;;  %v1718_v16 = vadd.f32 %v2512_v7, %v4082_v26 }
 0x356   : > { %v1765_v37 = vpop.f32.mrf.mxu1 }
 0x357   : > { %v2407_v32 = vmul.f32 -1.442695, %v1764_v21  ;;  %v1003_v21 = vpop.permute.xlu0 %1002  ;;  %v2518_v37 = vadd.f32 %v4107_v19, %v4097_v46 }
 0x358   : > { %v1766_v17 = vpop.f32.mrf.mxu1 }
 0x359   : > { %2725 = vpow2.f32 %v2407_v32  ;;  %v1767_v48 = vadd.f32 %v1766_v17, %v1702_v41  ;;  %v995_v41 = vpop.permute.xlu1 %994 }
 0x35a   : > { %v1768_v57 = vpop.f32.mrf.mxu1 }
 0x35b   : > { %v2408_v63 = vmul.f32 -1.442695, %v1767_v48  ;;  %v1726_v57 = vadd.f32 %v2518_v37, %v4052_v22  ;;  %v991_v4 = vpop.permute.xlu0 %990  ;;  %v1156_v37 = vadd.f32 %v4038_v47, %v1003_v21 }
 0x35c   : > { %v1771_v30 = vpop.f32.mrf.mxu1  ;;  %v1145_v34 = vadd.f32 %v4032_v59, %v991_v4 }
 0x35d   : > { %2727 = vpow2.f32 %v2408_v63  ;;  %v1772_v11 = vadd.f32 %v1771_v30, %v1707_v52  ;;  %v1872_v52 = vpop.permute.xlu1 %1871 }
 0x35e   : > { %v1773_v28 = vpop.f32.mrf.mxu1 }
 0x35f   : > { %v2409_v18 = vmul.f32 -1.442695, %v1772_v11  ;;  %v1868_v28 = vpop.permute.xlu0 %1867 }
 0x360   : > { %v1774_v5 = vpop.f32.mrf.mxu1 }
 0x361   : > { %2729 = vpow2.f32 %v2409_v18  ;;  %v1775_v9 = vadd.f32 %v1774_v5, %v1710_v31  ;;  %v1148_v5 = vadd.f32 %v4034_v54, %v995_v41  ;;  %v1860_v7 = vpop.permute.xlu1 %1859 }
 0x362   : > { %v1776_v42 = vpop.f32.mrf.mxu1 }
 0x363   : > { %v2410_v8 = vmul.f32 -1.442695, %v1775_v9 }
 0x364   : > { %v1779_v6 = vpop.f32.mrf.mxu1 }
 0x365   : > { %2731 = vpow2.f32 %v2410_v8  ;;  %v1780_v36 = vadd.f32 %v1779_v6, %v1715_v43  ;;  %v1864_v6 = vpop.permute.xlu0 %1863 }
 0x366   : > { %v2726_v49 = vpop.eup %2725  ;;  %v1781_v27 = vpop.f32.mrf.mxu1 }
 0x367   : > { %v1818_v35 = vadd.f32 1.0, %v2726_v49  ;;  %v2411_v12 = vmul.f32 -1.442695, %v1780_v36 }
 0x368   : > { %v1782_v15 = vpop.f32.mrf.mxu1 }
 0x369   : > { %2733 = vrcp.f32 %v1818_v35  ;;  %v1783_v10 = vadd.f32 %v1782_v15, %v1718_v16 }
 0x36a   : > { %v2728_v58 = vpop.eup %2727  ;;  %2735 = vpow2.f32 %v2411_v12  ;;  %v1784_v44 = vpop.f32.mrf.mxu1 }
 0x36b   : > { %v1819_v62 = vadd.f32 1.0, %v2728_v58  ;;  %v2412_v60 = vmul.f32 -1.442695, %v1783_v10 }
 0x36c   : > { %v1787_v38 = vpop.f32.mrf.mxu1 }
 0x36d   : > { %2737 = vrcp.f32 %v1819_v62  ;;  %v1788_v32 = vadd.f32 %v1787_v38, %v1723_v14 }
 0x36e   : > { %v2730_v26 = vpop.eup %2729  ;;  %2739 = vpow2.f32 %v2412_v60  ;;  %v1789_v17 = vpop.f32.mrf.mxu1 }
 0x36f   : > { %v1820_v48 = vadd.f32 1.0, %v2730_v26  ;;  %v2413_v53 = vmul.f32 -1.442695, %v1788_v32 }
 0x370   : > { %v1790_v40 = vpop.f32.mrf.mxu1 }
 0x371   : > { %2741 = vrcp.f32 %v1820_v48  ;;  %v1791_v63 = vadd.f32 %v1790_v40, %v1726_v57 }
 0x372   : > { %v2732_v46 = vpop.eup %2731  ;;  %2743 = vpow2.f32 %v2413_v53  ;;  %v1792_v19 = vpop.f32.mrf.mxu1  ;;  %v1161_v53 = vadd.f32 %v4040_v3, %v4087_v55  ;;  %v1169_v55 = vadd.f32 %v4044_v25, %v4069_v39 }
 0x373   : > { %v1821_v30 = vadd.f32 1.0, %v2732_v46  ;;  %v2414_v11 = vmul.f32 -1.442695, %v1791_v63  ;;  %v1164_v46 = vadd.f32 %v4042_v24, %v4102_v51 }
 0x374   : > { %v1209_v2 = vpop.f32.mrf.mxu0 }
 0x375   : > { %2745 = vrcp.f32 %v1821_v30  ;;  %v1210_v0 = vadd.f32 %v1209_v2, %v1145_v34 }
 0x376   : > { %v2734_v18 = vpop.eup %2733  ;;  %2747 = vpow2.f32 %v2414_v11  ;;  %v1211_v31 = vpop.f32.mrf.mxu0 }
 0x377   : > { %v2736_v22 = vpop.eup %2735  ;;  %v1842_v9 = vmul.f32 %v2734_v18, %v1210_v0 }
 0x378   : > { %v1822_v1 = vadd.f32 1.0, %v2736_v22  ;;  %v1212_v42 = vpop.f32.mrf.mxu0 }
 0x379   : > { %v1213_v8 = vadd.f32 %v1212_v42, %v1148_v5  ;;  %v1890_v27 = vmul.f32 %v1860_v7, %v1842_v9  ;;  %vm1850_vm11 = vcmp.gt.f32.partialorder %v1842_v9, 0.0 }
 0x37a   : > { %v2738_v43 = vpop.eup %2737  ;;  %2749 = vrcp.f32 %v1822_v1  ;;  %v1214_v59 = vpop.f32.mrf.mxu0 }
 0x37b   : > { %v2740_v36 = vpop.eup %2739  ;;  %v1843_v49 = vmul.f32 %v2738_v43, %v1213_v8  ;;  %v1898_v62 = vsel %vm1850_vm11, %v1842_v9, %v1890_v27  ;;  %v1172_v9 = vadd.f32 %v4046_v50, %v4143_v13  ;;  %v2718_v50 = vld [vmem:[%s4297_s5 + $0x8] sm:$0xff]   ;;  %v2721_v13 = vld [vmem:[%s4297_s5 + $0x20] sm:$0xff]  }
 0x37c   : > { %v1823_v35 = vadd.f32 1.0, %v2740_v36  ;;  %v1217_v12 = vpop.f32.mrf.mxu0 }
 0x37d   : > { %vm1851_vm12 = vcmp.gt.f32.partialorder %v1843_v49, 0.0  ;;  %v1891_v54 = vmul.f32 %v1864_v6, %v1843_v49  ;;  %v1218_v16 = vadd.f32 %v1217_v12, %v1153_v23  ;;  %v2722_v23 = vld [vmem:[%s4297_s5 + $0x28] sm:$0xff]   ;;  %v2724_v12 = vld [vmem:[%s4297_s5 + $0x38] sm:$0xff]  }
 0x37e   : > { %v2742_v15 = vpop.eup %2741  ;;  %2751 = vrcp.f32 %v1823_v35  ;;  %v1219_v10 = vpop.f32.mrf.mxu0  ;;  %v2723_v35 = vld [vmem:[%s4297_s5 + $0x30] sm:$0xff]  }
 0x37f   : > { %v2744_v58 = vpop.eup %2743  ;;  %v1844_v44 = vmul.f32 %v2742_v15, %v1218_v16  ;;  %v1899_v60 = vsel %vm1851_vm12, %v1843_v49, %v1891_v54  ;;  %v1945_v54 = vpop.permute.xlu1 %1944 }
 0x380   : > { %v1824_v14 = vadd.f32 1.0, %v2744_v58  ;;  %v1220_v38 = vpop.f32.mrf.mxu0  ;;  %v1906_v32 = vpack.c.bf16 %v1899_v60, %v1898_v62  ;;  %v1950_v15 = vpop.permute.xlu0 %1949 }
 0x381   : > { %v1221_v26 = vadd.f32 %v1220_v38, %v1156_v37  ;;  %v1892_v17 = vmul.f32 %v1868_v28, %v1844_v44  ;;  %vm1852_vm13 = vcmp.gt.f32.partialorder %v1844_v44, 0.0  ;;  %v2765_v38 = vld [vmem:[%s2990_s23 + $0x10] sm:$0xff] }
 0x382   : > { %v2746_v61 = vpop.eup %2745  ;;  %2753 = vrcp.f32 %v1824_v14  ;;  %v1222_v33 = vpop.f32.mrf.mxu0 }
 0x383   : > { %v2748_v41 = vpop.eup %2747  ;;  %v1845_v48 = vmul.f32 %v2746_v61, %v1221_v26  ;;  %v1900_v19 = vsel %vm1852_vm13, %v1844_v44, %v1892_v17  ;;  %v1955_v16 = vpop.permute.xlu1 %1954 }
 0x384   : > { %v1825_v57 = vadd.f32 1.0, %v2748_v41  ;;  %v1225_v4 = vpop.f32.mrf.mxu0  ;;  %v1965_v58 = vpop.permute.xlu0 %1964  ;;  %v2766_v41 = vld [vmem:[%s2990_s23] sm:$0xff] }
 0x385   : > { %vm1853_vm14 = vcmp.gt.f32.partialorder %v1845_v48, 0.0  ;;  %v1893_v47 = vmul.f32 %v1872_v52, %v1845_v48  ;;  %v1226_v21 = vadd.f32 %v1225_v4, %v1161_v53  ;;  %v2767_v4 = vld [vmem:[%s2990_s23 + $0x18] sm:$0xff] }
 0x386   : > { %2755 = vrcp.f32 %v1825_v57  ;;  %v1227_v40 = vpop.f32.mrf.mxu0 }
 0x387   : > { %v2750_v63 = vpop.eup %2749  ;;  %v1901_v34 = vsel %vm1853_vm14, %v1845_v48, %v1893_v47  ;;  %v1960_v10 = vpop.permute.xlu1 %1959 }
 0x388   : > { %v1846_v30 = vmul.f32 %v2750_v63, %v1226_v21  ;;  %v1228_v11 = vpop.f32.mrf.mxu0  ;;  %v1907_v2 = vpack.c.bf16 %v1901_v34, %v1900_v19  ;;  %v1975_v62 = vpop.permute.xlu0 %1974  ;;  %v2768_v63 = vld [vmem:[%s2990_s23 + $0x8] sm:$0xff] }
 0x389   : > { %v1229_v28 = vadd.f32 %v1228_v11, %v1164_v46  ;;  %v2769_v11 = vld [vmem:[%s2990_s23 + $0x30] sm:$0xff] }
 0x38a   : > { %v1230_v0 = vpop.f32.mrf.mxu0  ;;  %v1894_v52 = vmul.f32 %v4138_v20, %v1846_v30  ;;  %vm1854_vm15 = vcmp.gt.f32.partialorder %v1846_v30, 0.0 }
 0x38b   : > { %v2752_v3 = vpop.eup %2751  ;;  %v1970_v44 = vpop.permute.xlu1 %1969 }
 0x38c   : > { %v1847_v18 = vmul.f32 %v2752_v3, %v1229_v28  ;;  %v1233_v31 = vpop.f32.mrf.mxu0  ;;  %v1902_v7 = vsel %vm1854_vm15, %v1846_v30, %v1894_v52  ;;  %v1985_v57 = vpop.permute.xlu0 %1984 }
 0x38d   : > { %v1234_v22 = vadd.f32 %v1233_v31, %v1169_v55  ;;  %v2770_v55 = vld [vmem:[%s2990_s23 + $0x20] sm:$0xff] }
 0x38e   : > { %vm1855_vm0 = vcmp.gt.f32.partialorder %v1847_v18, 0.0  ;;  %v1895_v24 = vmul.f32 %v4148_v56, %v1847_v18  ;;  %v1235_v51 = vpop.f32.mrf.mxu0 }
 0x38f   : > { %v2754_v5 = vpop.eup %2753  ;;  %v1980_v61 = vpop.permute.xlu1 %1979 }
 0x390   : > { %v1848_v1 = vmul.f32 %v2754_v5, %v1234_v22  ;;  %v1236_v42 = vpop.f32.mrf.mxu0  ;;  %v1903_v8 = vsel %vm1855_vm0, %v1847_v18, %v1895_v24  ;;  %v1995_v3 = vpop.permute.xlu0 %1994  ;;  %v2771_v22 = vld [vmem:[%s2990_s23 + $0x38] sm:$0xff] }
 0x391   : > { %v1237_v43 = vadd.f32 %v1236_v42, %v1172_v9  ;;  %v1908_v25 = vpack.c.bf16 %v1903_v8, %v1902_v7 }
 0x392   : > { %v1238_v39 = vpop.f32.mrf.mxu0  ;;  %v1896_v59 = vmul.f32 %v4131_v45, %v1848_v1  ;;  %vm1856_vm1 = vcmp.gt.f32.partialorder %v1848_v1, 0.0  ;;  %v2719_v45 = vld [vmem:[%s4297_s5 + $0x10] sm:$0xff]  }
 0x393   : > { %v2756_v20 = vpop.eup %2755  ;;  %v1990_v34 = vpop.permute.xlu1 %1989 }
 0x394   : > { %v1849_v6 = vmul.f32 %v2756_v20, %v1237_v43  ;;  %v1904_v36 = vsel %vm1856_vm1, %v1848_v1, %v1896_v59  ;;  %v2772_v1 = vld [vmem:[%s2990_s23 + $0x28] sm:$0xff]  ;;  %v2005_v43 = vpop.permute.xlu0 %2004 }
 0x396   : > { %vm1857_vm2 = vcmp.gt.f32.partialorder %v1849_v6, 0.0  ;;  %v1897_v56 = vmul.f32 %v4115_v29, %v1849_v6  ;;  %v2720_v29 = vld [vmem:[%s4297_s5 + $0x18] sm:$0xff]  }
 0x398   : > { %v1905_v49 = vsel %vm1857_vm2, %v1849_v6, %v1897_v56  ;;  %v2774_v6 = vld [vmem:[%s2990_s23 + $0x40] sm:$0xff] }
 0x399   : > { %v1909_v27 = vpack.c.bf16 %v1905_v49, %v1904_v36 }
 0x39b   : > { %2531 = vmatprep.subr.bf16.mxu0 %v1909_v27  ;;  %v2000_v5 = vpop.permute.xlu1 %1999 }
 0x39c   : > { %2532 = vmatpush3.bf16.msra.mxu0 %v1909_v27 }
 0x39d   : > { %2533 = vmatprep.subr.bf16.mxu0 %v1908_v25 }
 0x3a0   : > { %2534 = vmatpush3.bf16.msra.mxu0 %v1908_v25  ;;  %v2773_v25 = vld [vmem:[%s2990_s23 + $0x50] sm:$0xff] }
 0x3a1   : > { %2535 = vmatprep.subr.bf16.mxu0 %v1907_v2 }
 0x3a4   : > { %2536 = vmatpush3.bf16.msra.mxu0 %v1907_v2 }
 0x3a5   : > { %2537 = vmatprep.subr.bf16.mxu0 %v1906_v32 }
 0x3a7   : > { %v2010_v49 = vpop.permute.xlu1 %2009 }
 0x3a8   : > { %2538 = vmatpush3.bf16.msra.mxu0 %v1906_v32 }
 0x3ab   : > { %2540 = vmatmul.mubr.msk.bf16.vlgmr.msra.gmra.mxu0 %vm1097_vm8, %v2718_v50  ;;  %v2775_v50 = vld [vmem:[%s2990_s23 + $0x58] sm:$0xff] }
 0x3ac   : > { %2543 = vmatprep.mubr.msk.bf16.mxu0 %vm1097_vm8, %v2719_v45 }
 0x3b3   : > { %2544 = vmatmul.mubr.msk.bf16.gmra.mxu0 %vm1097_vm8, %v2720_v29 }
 0x3b4   : > { %2547 = vmatprep.mubr.msk.bf16.mxu0 %vm1097_vm8, %v2721_v13  ;;  %v2015_v13 = vpop.permute.xlu0 %2014 }
 0x3bb   : > { %2548 = vmatmul.mubr.msk.bf16.gmra.mxu0 %vm1097_vm8, %v2722_v23 }
 0x3bc   : > { %2551 = vmatprep.mubr.msk.bf16.mxu0 %vm1097_vm8, %v2723_v35  ;;  %v2776_v35 = vld [vmem:[%s2990_s23 + $0x48] sm:$0xff] }
 0x3c3   : > { %2552 = vmatmul.mubr.msk.bf16.gmra.mxu0 %vm1097_vm8, %v2724_v12 }
 0x46b   : > { %v2541_v37 = vpop.f32.mrf.mxu0 }
 0x46c   : > { %v2129_v60 = vadd.f32 %v2541_v37, %v1955_v16 }
 0x46d   : > { %v2120_v14 = vpop.f32.mrf.mxu0 }
 0x46e   : > { %v2185_v32 = vadd.f32 %v2765_v38, %v2129_v60  ;;  %v2121_v26 = vadd.f32 %v2120_v14, %v1945_v54 }
 0x46f   : > { %v2542_v33 = vpop.f32.mrf.mxu0 }
 0x470   : > { %2201 = vst [vmem:[%s4203_s20 + $0x10] sm:$0xff] %v2185_v32  ;;  %v2183_v17 = vadd.f32 %v2766_v41, %v2121_v26  ;;  %v2132_v48 = vadd.f32 %v2542_v33, %v1960_v10  ;;  %v2779_v32 = vld [vmem:[%s2990_s23 + $0x78] sm:$0xff]  ;;  %v2780_v33 = vld [vmem:[%s2990_s23 + $0x68] sm:$0xff] }
 0x471   : > { %v2123_v53 = vpop.f32.mrf.mxu0 }
 0x472   : > { %2199 = vst [vmem:[%s4203_s20] sm:$0xff] %v2183_v17  ;;  %v2186_v47 = vadd.f32 %v2767_v4, %v2132_v48  ;;  %v2124_v21 = vadd.f32 %v2123_v53, %v1950_v15  ;;  %v2777_v15 = vld [vmem:[%s2990_s23 + $0x70] sm:$0xff] }
 0x473   : > { %v2545_v40 = vpop.f32.mrf.mxu0 }
 0x474   : > { %2202 = vst [vmem:[%s4203_s20 + $0x18] sm:$0xff] %v2186_v47  ;;  %v2184_v46 = vadd.f32 %v2768_v63, %v2124_v21  ;;  %v2145_v19 = vadd.f32 %v2545_v40, %v1975_v62  ;;  %v2778_v62 = vld [vmem:[%s2990_s23 + $0x60] sm:$0xff] }
 0x475   : > { %v2136_v30 = vpop.f32.mrf.mxu0 }
 0x476   : > { %2200 = vst [vmem:[%s4203_s20 + $0x8] sm:$0xff] %v2184_v46  ;;  %v2189_v2 = vadd.f32 %v2769_v11, %v2145_v19  ;;  %v2137_v28 = vadd.f32 %v2136_v30, %v1965_v58 }
 0x477   : > { %v2546_v0 = vpop.f32.mrf.mxu0 }
 0x478   : > { %2205 = vst [vmem:[%s4203_s20 + $0x30] sm:$0xff] %v2189_v2  ;;  %v2187_v52 = vadd.f32 %v2770_v55, %v2137_v28  ;;  %v2148_v18 = vadd.f32 %v2546_v0, %v1980_v61 }
 0x479   : > { %v2139_v31 = vpop.f32.mrf.mxu0 }
 0x47a   : > { %2203 = vst [vmem:[%s4203_s20 + $0x20] sm:$0xff] %v2187_v52  ;;  %v2190_v24 = vadd.f32 %v2771_v22, %v2148_v18  ;;  %v2140_v51 = vadd.f32 %v2139_v31, %v1970_v44  ;;  %v2020_v44 = vpop.permute.xlu1 %2019 }
 0x47b   : > { %v2549_v9 = vpop.f32.mrf.mxu0 }
 0x47c   : > { %2206 = vst [vmem:[%s4203_s20 + $0x38] sm:$0xff] %v2190_v24  ;;  %v2188_v42 = vadd.f32 %v2772_v1, %v2140_v51  ;;  %v2161_v7 = vadd.f32 %v2549_v9, %v1995_v3 }
 0x47d   : > { %v2152_v8 = vpop.f32.mrf.mxu0 }
 0x47e   : > { %2204 = vst [vmem:[%s4203_s20 + $0x28] sm:$0xff] %v2188_v42  ;;  %v2193_v39 = vadd.f32 %v2773_v25, %v2161_v7  ;;  %v2153_v20 = vadd.f32 %v2152_v8, %v1985_v57 }
 0x47f   : > { %v2550_v59 = vpop.f32.mrf.mxu0 }
 0x480   : > { %2209 = vst [vmem:[%s4203_s20 + $0x50] sm:$0xff] %v2193_v39  ;;  %v2191_v56 = vadd.f32 %v2774_v6, %v2153_v20  ;;  %v2164_v36 = vadd.f32 %v2550_v59, %v2000_v5 }
 0x481   : > { %v2155_v27 = vpop.f32.mrf.mxu0 }
 0x482   : > { %2207 = vst [vmem:[%s4203_s20 + $0x40] sm:$0xff] %v2191_v56  ;;  %v2194_v45 = vadd.f32 %v2775_v50, %v2164_v36  ;;  %v2156_v29 = vadd.f32 %v2155_v27, %v1990_v34 }
 0x483   : > { %v2553_v23 = vpop.f32.mrf.mxu0 }
 0x484   : > { %2210 = vst [vmem:[%s4203_s20 + $0x58] sm:$0xff] %v2194_v45  ;;  %v2192_v12 = vadd.f32 %v2776_v35, %v2156_v29  ;;  %v2177_v54 = vadd.f32 %v2553_v23, %v2015_v13 }
 0x485   : > { %v2168_v16 = vpop.f32.mrf.mxu0 }
 0x486   : > { %2208 = vst [vmem:[%s4203_s20 + $0x48] sm:$0xff] %v2192_v12  ;;  %v2197_v10 = vadd.f32 %v2777_v15, %v2177_v54  ;;  %v2169_v58 = vadd.f32 %v2168_v16, %v2005_v43 }
 0x487   : > { %v2554_v37 = vpop.f32.mrf.mxu0 }
 0x488   : > { %2213 = vst [vmem:[%s4203_s20 + $0x70] sm:$0xff] %v2197_v10  ;;  %v2195_v60 = vadd.f32 %v2778_v62, %v2169_v58  ;;  %v2180_v14 = vadd.f32 %v2554_v37, %v2020_v44 }
 0x489   : > { %v2171_v38 = vpop.f32.mrf.mxu0 }
 0x48a   : > { %2211 = vst [vmem:[%s4203_s20 + $0x60] sm:$0xff] %v2195_v60  ;;  %v2198_v26 = vadd.f32 %v2779_v32, %v2180_v14  ;;  %v2172_v61 = vadd.f32 %v2171_v38, %v2010_v49 }
 0x48c   : > { %2214 = vst [vmem:[%s4203_s20 + $0x78] sm:$0xff] %v2198_v26  ;;  %v2196_v41 = vadd.f32 %v2780_v33, %v2172_v61 }
 0x48e   : > { %2212 = vst [vmem:[%s4203_s20 + $0x68] sm:$0xff] %v2196_v41 }
 0x48f   : > { %2794 = shalt.err (!%p2791_p5)
}
 0x490   : > { %s2795_s23 = scalar_lea.hbm %s4238_s16, 2048  ;;  %s2799_s26 = scalar_lea.hbm %s4300_s8, 4096 }
 0x491   : > { %p2796_p6 = scmp.ne.s32.totalorder %s4238_s16, %s2795_s23  ;;  %p2800_p10 = scmp.lt.s32.totalorder %s4238_s16, %s4300_s8 }
 0x492   : > { %p2801_p11 = scmp.lt.s32.totalorder %s2799_s26, %s2795_s23 }
 0x493   : > { %p2797_p7 = pnand %p2796_p6, %p2962_p4 }
 0x494   : > { %p2802_p12 = por %p2801_p11, %p2800_p10 }
 0x495   : > { %p2798_p9 = pneg %p2797_p7 }
 0x497   : > { %p2803_p13 = pnand %p2802_p12, %p2798_p9 }
 0x499   : > { %2806 = shalt.err (!%p2803_p13)
}
 0x49a   : > { %s2875_s21 = smov 128   ;;  %s2876_s22 = smov 8  }
 0x49b   : > { %2555 = dma.vmem_to_hbm [thread:$0]  (%p2962_p4), %s4240_s11, 2048, %s4238_s16, %s4247_s30, %s2875_s21, %s2875_s21, %s2876_s22  }
 0x49c PF: > { %p2561_p0 = scmp.ge.s32.totalorder %s2857_s10, 2  ;;  %s2245_s24 = sand.u32 1, %s2837_s27  }
 0x49d   : > { %s2246_s19 = scalar_lea.sflag [#allocation3], %s2245_s24 }
 0x49e   : > { %p2558_p1 = pnand %p2561_p0, %p2969_p8 }
 0x4a0   : > { %p2559_p2 = pneg %p2558_p1 }
 0x4a2   : > { %2832 = dma.done.wait (%p2559_p2), %s2246_s19, 2048  }
 0x4a3   : > { %2834 = vsyncadd (%p2559_p2), %s2246_s19, 4294965248  ;;  %s21_s10 = sadd.s32 1, %s2857_s10   ;;  %s4308_s27 = smov %s2841_s28 }
 0x4a4   : > { %p18_p3 = scmp.ge.s32.totalorder %s21_s10, 4   ;;  %s4309_s28 = smov %s2845_s29 }
 0x4a5   : > { %s4310_s29 = smov %s2975_s18  ;;  %s4311_s30 = smov %s2853_s9 }
 0x4a6   : > { %s4312_s9 = smov %s4314_s13  ;;  %20 = sbr.rel (!%p18_p3) target bundleno = 4 (0x4), region = 90 }
 0x4ab   :  { %2251 = vsyncpa [#allocation3], 1 }
 0x4ac   :  { %2253 = vsyncpa [#allocation3 + $0x1], 1 }

</bundles_post_ra>
